<compile_context>
chip_gen: v7x
topology: tpu7x:2x2x1
jax: 0.10.0
libtpu: 0.0.40
codegen_flags: <defaults>
</compile_context>

<pallas_src>
import numpy as np
import jax
import jax.numpy as jnp
from jax.experimental import pallas as pl
from jax.experimental.pallas import tpu as pltpu

PAD = 128          # padded feature width (lane-dense everywhere)
FIN_PAD = 32       # padded contraction width (multiple of 8 sublanes, >= 20)
NUM_LAYERS = 12    # fc_b1, fc_b2, fc_i1, fc_i2, conv1..conv6, fc1, fc2

PACK_ORDER = (
    ("fc_boundary1", 3, 20),
    ("fc_boundary2", 20, 20),
    ("fc_interior1", 2, 20),
    ("fc_interior2", 20, 20),
    ("conv1", 20, 20),
    ("conv2", 20, 20),
    ("conv3", 20, 20),
    ("conv4", 20, 20),
    ("conv5", 20, 20),
    ("conv6", 20, 20),
    ("fc1", 20, 20),
    ("fc2", 20, 1),
)


# ----------------------------------------------------------------------------- kernel
def net_separate_kernel(xin_ref, adj_ref, w_ref, b_ref, out_ref):
    xin = xin_ref[...]        # [N, 128]  cols 0,1 = x ; col 2 = y ; col 3/4 = b/i flags

    def dense(h, k, relu=True):
        # contract only the live 32 columns against the [32, 128] weight slice
        out = (jnp.dot(h[:, :FIN_PAD], w_ref[k], preferred_element_type=jnp.float32)
               + b_ref[k:k + 1, :])
        return jnp.maximum(out, 0.0) if relu else out

    # boundary / interior encoders, evaluated densely on all rows then flag-selected.
    # Flags ride in xin lanes 3/4; their weight rows are zero so they never leak into
    # the matmuls. Interior assignment wins, matching PyTorch's second scatter.
    hb = dense(dense(xin, 0, True), 1, False)     # fc_boundary1 -> relu -> fc_boundary2
    hi = dense(dense(xin, 2, True), 3, False)     # fc_interior1 -> relu -> fc_interior2
    h = jnp.where(xin[:, 4:5] > 0.5, hi,
                  jnp.where(xin[:, 3:4] > 0.5, hb, 0.0))
    h = jnp.maximum(h, 0.0)

    # six GCNConv(20, 20) layers, each followed by relu
    adj = adj_ref[...]        # deferred to first use: [N, N] normalized adjacency
    for k in range(4, 10):
        hw = jnp.dot(h[:, :FIN_PAD], w_ref[k], preferred_element_type=jnp.float32)
        h = jnp.maximum(
            jnp.dot(adj, hw, preferred_element_type=jnp.float32) + b_ref[k:k + 1, :],
            0.0)

    h = dense(h, 10, True)                 # fc1 + relu
    out_ref[...] = dense(h, 11, False)     # fc2 (no activation); column 0 is the result


# ----------------------------------------------------------------------------- wrapper
def pack_params(params):
    """Build the packed slabs ONCE (host-side numpy, no per-call scatter traffic)."""
    w_slab = np.zeros((NUM_LAYERS, FIN_PAD, PAD), np.float32)
    b_slab = np.zeros((NUM_LAYERS, PAD), np.float32)
    for k, (name, fin, fout) in enumerate(PACK_ORDER):
        W, b = params[name]
        w_slab[k, :fin, :fout] = np.asarray(W)
        b_slab[k, :fout] = np.asarray(b)
    return jnp.asarray(w_slab), jnp.asarray(b_slab)


@jax.jit
def net_separate_forward(x, y, adj_hat, bmask, imask, w_slab, b_slab):
    N = x.shape[0]

    # padded node-input slab: cols 0,1 = x, col 2 = y, cols 3/4 = boundary/interior flag
    xin = jnp.concatenate(
        [x, y[:, None], bmask[:, None], imask[:, None],
         jnp.zeros((N, PAD - 5), jnp.float32)], axis=1)

    vmem = pl.BlockSpec(memory_space=pltpu.MemorySpace.VMEM)
    out = pl.pallas_call(
        net_separate_kernel,
        out_shape=jax.ShapeDtypeStruct((N, PAD), jnp.float32),   # lane-dense output slab
        in_specs=[vmem] * 4,
        out_specs=vmem,
        # small kernel, all operands resident; limit only matters for the future
        # row-tiled large-N version (size against 64 MiB on v7x).
        compiler_params=pltpu.CompilerParams(vmem_limit_bytes=32 * 1024 * 1024),
    )(xin, adj_hat, w_slab, b_slab)

    return out[:, :1]   # fc2 result lives in column 0


# ----------------------------------------------------------------------------- glue
def build_normalized_adjacency(edge_index, num_nodes):
    """Dense Ahat = D^-1/2 (A + I) D^-1/2 with PyG GCNConv conventions."""
    src, dst = edge_index[0], edge_index[1]
    a = jnp.zeros((num_nodes, num_nodes), jnp.float32)
    a = a.at[dst, src].add(1.0)                      # message j -> i
    a = a + jnp.eye(num_nodes, dtype=jnp.float32)    # self loops
    deg = a.sum(axis=1)
    d_inv_sqrt = jnp.where(deg > 0, 1.0 / jnp.sqrt(deg), 0.0)
    return d_inv_sqrt[:, None] * a * d_inv_sqrt[None, :]


def init_params(key):
    """Deterministic synthetic parameters (weights stored as [in, out])."""
    # TODO(synk): synthetic init; does not reproduce PyTorch Linear/GCNConv init exactly.
    keys = jax.random.split(key, 2 * len(PACK_ORDER))
    params = {}
    for i, (name, fin, fout) in enumerate(PACK_ORDER):
        s = 1.0 / float(fin) ** 0.5
        W = jax.random.uniform(keys[2 * i], (fin, fout), jnp.float32, -s, s)
        b = jax.random.uniform(keys[2 * i + 1], (fout,), jnp.float32, -s, s)
        params[name] = (W, b)
    return params


def reference_forward(x, y, adj_hat, boundary_index, interior_index, params):
    def lin(h, name, act):
        W, b = params[name]
        h = h @ W + b
        return jnp.maximum(h, 0.0) if act else h

    xb = jnp.concatenate([x[boundary_index], y[boundary_index][:, None]], axis=1)
    xb = lin(lin(xb, "fc_boundary1", True), "fc_boundary2", False)
    xi = lin(x[interior_index], "fc_interior1", True)
    xi = lin(xi, "fc_interior2", False)

    h = jnp.zeros((x.shape[0], 20), jnp.float32)
    h = h.at[boundary_index].set(xb)
    h = h.at[interior_index].set(xi)
    h = jnp.maximum(h, 0.0)

    for k in range(1, 7):
        W, b = params[f"conv{k}"]
        h = jnp.maximum(adj_hat @ (h @ W) + b, 0.0)

    h = lin(h, "fc1", True)
    return lin(h, "fc2", False)


# ----------------------------------------------------------------------------- main
if __name__ == "__main__":
    key = jax.random.PRNGKey(0)
    k_x, k_y, k_e, k_perm, k_p = jax.random.split(key, 5)

    N = 128    # nodes (full MXU M tile, lane-dense adjacency)
    E = 512    # directed edges
    NB = 32    # boundary nodes

    x = jax.random.normal(k_x, (N, 2), jnp.float32)          # data.x
    y = jax.random.normal(k_y, (N,), jnp.float32)             # data.y
    edge_index = jax.random.randint(k_e, (2, E), 0, N, dtype=jnp.int32)
    perm = jax.random.permutation(k_perm, N)
    boundary_index = perm[:NB]
    interior_index = perm[NB:]

    adj_hat = build_normalized_adjacency(edge_index, N)
    params = init_params(k_p)

    # one-time, out of the per-call path: packed slabs + membership flag vectors
    w_slab, b_slab = pack_params(params)
    bmask = jnp.zeros((N,), jnp.float32).at[boundary_index].set(1.0)
    imask = jnp.zeros((N,), jnp.float32).at[interior_index].set(1.0)

    out = net_separate_forward(x, y, adj_hat, bmask, imask, w_slab, b_slab)
    out = jax.block_until_ready(out)

    ref = reference_forward(x, y, adj_hat, boundary_index, interior_index, params)
    assert out.shape == (N, 1)
    assert jnp.allclose(out, ref, atol=5e-3, rtol=5e-3), float(jnp.max(jnp.abs(out - ref)))

    print("KERNEL_OK")
</pallas_src>

<mosaic_0001>
module attributes {stable_mosaic.version = 11 : i64} {
  func.func @net_separate_kernel(%arg0: memref<128x128xf32, #tpu.memory_space<vmem>>, %arg1: memref<128x128xf32, #tpu.memory_space<vmem>>, %arg2: memref<12x32x128xf32, #tpu.memory_space<vmem>>, %arg3: memref<12x128xf32, #tpu.memory_space<vmem>>, %arg4: memref<128x128xf32, #tpu.memory_space<vmem>>) attributes {dimension_semantics = [], scalar_prefetch = 0 : i64, scratch_operands = 0 : i64, tpu.core_type = #tpu.core_type<tc>} {
    %c0 = arith.constant 0 : index
    %c0_0 = arith.constant 0 : index
    %0 = vector.load %arg0[%c0, %c0_0] : memref<128x128xf32, #tpu.memory_space<vmem>>, vector<128x128xf32>
    %1 = vector.extract_strided_slice %0 {offsets = [0, 0], sizes = [128, 32], strides = [1, 1]} : vector<128x128xf32> to vector<128x32xf32>
    %c0_1 = arith.constant 0 : index
    %c0_2 = arith.constant 0 : index
    %c0_3 = arith.constant 0 : index
    %2 = vector.load %arg2[%c0_1, %c0_2, %c0_3] : memref<12x32x128xf32, #tpu.memory_space<vmem>>, vector<1x32x128xf32>
    %3 = vector.shape_cast %2 : vector<1x32x128xf32> to vector<32x128xf32>
    %cst = arith.constant dense<0.000000e+00> : vector<128x128xf32>
    %4 = tpu.matmul %1, %3, %cst {dimension_numbers = #tpu.dot_dimension_numbers<[1], [0], [0], [1], [0, 0, 1, 1], [], []>} : vector<128x32xf32>, vector<32x128xf32>, vector<128x128xf32> -> vector<128x128xf32>
    %c0_4 = arith.constant 0 : index
    %c0_5 = arith.constant 0 : index
    %5 = vector.load %arg3[%c0_4, %c0_5] : memref<12x128xf32, #tpu.memory_space<vmem>>, vector<1x128xf32>
    %6 = vector.broadcast %5 : vector<1x128xf32> to vector<128x128xf32>
    %7 = arith.addf %4, %6 : vector<128x128xf32>
    %cst_6 = arith.constant 0.000000e+00 : f32
    %8 = vector.broadcast %cst_6 : f32 to vector<128x128xf32>
    %9 = arith.maximumf %7, %8 : vector<128x128xf32>
    %10 = vector.extract_strided_slice %9 {offsets = [0, 0], sizes = [128, 32], strides = [1, 1]} : vector<128x128xf32> to vector<128x32xf32>
    %c1 = arith.constant 1 : index
    %c0_7 = arith.constant 0 : index
    %c0_8 = arith.constant 0 : index
    %11 = vector.load %arg2[%c1, %c0_7, %c0_8] : memref<12x32x128xf32, #tpu.memory_space<vmem>>, vector<1x32x128xf32>
    %12 = vector.shape_cast %11 : vector<1x32x128xf32> to vector<32x128xf32>
    %cst_9 = arith.constant dense<0.000000e+00> : vector<128x128xf32>
    %13 = tpu.matmul %10, %12, %cst_9 {dimension_numbers = #tpu.dot_dimension_numbers<[1], [0], [0], [1], [0, 0, 1, 1], [], []>} : vector<128x32xf32>, vector<32x128xf32>, vector<128x128xf32> -> vector<128x128xf32>
    %c1_10 = arith.constant 1 : index
    %c0_11 = arith.constant 0 : index
    %14 = vector.load %arg3[%c1_10, %c0_11] : memref<12x128xf32, #tpu.memory_space<vmem>>, vector<1x128xf32>
    %15 = vector.broadcast %14 : vector<1x128xf32> to vector<128x128xf32>
    %16 = arith.addf %13, %15 : vector<128x128xf32>
    %17 = vector.extract_strided_slice %0 {offsets = [0, 0], sizes = [128, 32], strides = [1, 1]} : vector<128x128xf32> to vector<128x32xf32>
    %c2 = arith.constant 2 : index
    %c0_12 = arith.constant 0 : index
    %c0_13 = arith.constant 0 : index
    %18 = vector.load %arg2[%c2, %c0_12, %c0_13] : memref<12x32x128xf32, #tpu.memory_space<vmem>>, vector<1x32x128xf32>
    %19 = vector.shape_cast %18 : vector<1x32x128xf32> to vector<32x128xf32>
    %cst_14 = arith.constant dense<0.000000e+00> : vector<128x128xf32>
    %20 = tpu.matmul %17, %19, %cst_14 {dimension_numbers = #tpu.dot_dimension_numbers<[1], [0], [0], [1], [0, 0, 1, 1], [], []>} : vector<128x32xf32>, vector<32x128xf32>, vector<128x128xf32> -> vector<128x128xf32>
    %c2_15 = arith.constant 2 : index
    %c0_16 = arith.constant 0 : index
    %21 = vector.load %arg3[%c2_15, %c0_16] : memref<12x128xf32, #tpu.memory_space<vmem>>, vector<1x128xf32>
    %22 = vector.broadcast %21 : vector<1x128xf32> to vector<128x128xf32>
    %23 = arith.addf %20, %22 : vector<128x128xf32>
    %cst_17 = arith.constant 0.000000e+00 : f32
    %24 = vector.broadcast %cst_17 : f32 to vector<128x128xf32>
    %25 = arith.maximumf %23, %24 : vector<128x128xf32>
    %26 = vector.extract_strided_slice %25 {offsets = [0, 0], sizes = [128, 32], strides = [1, 1]} : vector<128x128xf32> to vector<128x32xf32>
    %c3 = arith.constant 3 : index
    %c0_18 = arith.constant 0 : index
    %c0_19 = arith.constant 0 : index
    %27 = vector.load %arg2[%c3, %c0_18, %c0_19] : memref<12x32x128xf32, #tpu.memory_space<vmem>>, vector<1x32x128xf32>
    %28 = vector.shape_cast %27 : vector<1x32x128xf32> to vector<32x128xf32>
    %cst_20 = arith.constant dense<0.000000e+00> : vector<128x128xf32>
    %29 = tpu.matmul %26, %28, %cst_20 {dimension_numbers = #tpu.dot_dimension_numbers<[1], [0], [0], [1], [0, 0, 1, 1], [], []>} : vector<128x32xf32>, vector<32x128xf32>, vector<128x128xf32> -> vector<128x128xf32>
    %c3_21 = arith.constant 3 : index
    %c0_22 = arith.constant 0 : index
    %30 = vector.load %arg3[%c3_21, %c0_22] : memref<12x128xf32, #tpu.memory_space<vmem>>, vector<1x128xf32>
    %31 = vector.broadcast %30 : vector<1x128xf32> to vector<128x128xf32>
    %32 = arith.addf %29, %31 : vector<128x128xf32>
    %33 = vector.extract_strided_slice %0 {offsets = [0, 4], sizes = [128, 1], strides = [1, 1]} : vector<128x128xf32> to vector<128x1xf32>
    %cst_23 = arith.constant 5.000000e-01 : f32
    %34 = vector.broadcast %cst_23 : f32 to vector<128x1xf32>
    %35 = arith.cmpf ogt, %33, %34 : vector<128x1xf32>
    %36 = vector.extract_strided_slice %0 {offsets = [0, 3], sizes = [128, 1], strides = [1, 1]} : vector<128x128xf32> to vector<128x1xf32>
    %cst_24 = arith.constant 5.000000e-01 : f32
    %37 = vector.broadcast %cst_24 : f32 to vector<128x1xf32>
    %38 = arith.cmpf ogt, %36, %37 : vector<128x1xf32>
    %cst_25 = arith.constant 0.000000e+00 : f32
    %39 = vector.shape_cast %38 : vector<128x1xi1> to vector<128x1xi1>
    %40 = vector.broadcast %39 : vector<128x1xi1> to vector<128x128xi1>
    %41 = vector.broadcast %cst_25 : f32 to vector<128x128xf32>
    %42 = arith.select %40, %16, %41 : vector<128x128xi1>, vector<128x128xf32>
    %43 = vector.shape_cast %35 : vector<128x1xi1> to vector<128x1xi1>
    %44 = vector.broadcast %43 : vector<128x1xi1> to vector<128x128xi1>
    %45 = arith.select %44, %32, %42 : vector<128x128xi1>, vector<128x128xf32>
    %cst_26 = arith.constant 0.000000e+00 : f32
    %46 = vector.broadcast %cst_26 : f32 to vector<128x128xf32>
    %47 = arith.maximumf %45, %46 : vector<128x128xf32>
    %c0_27 = arith.constant 0 : index
    %c0_28 = arith.constant 0 : index
    %48 = vector.load %arg1[%c0_27, %c0_28] : memref<128x128xf32, #tpu.memory_space<vmem>>, vector<128x128xf32>
    %49 = vector.extract_strided_slice %47 {offsets = [0, 0], sizes = [128, 32], strides = [1, 1]} : vector<128x128xf32> to vector<128x32xf32>
    %c4 = arith.constant 4 : index
    %c0_29 = arith.constant 0 : index
    %c0_30 = arith.constant 0 : index
    %50 = vector.load %arg2[%c4, %c0_29, %c0_30] : memref<12x32x128xf32, #tpu.memory_space<vmem>>, vector<1x32x128xf32>
    %51 = vector.shape_cast %50 : vector<1x32x128xf32> to vector<32x128xf32>
    %cst_31 = arith.constant dense<0.000000e+00> : vector<128x128xf32>
    %52 = tpu.matmul %49, %51, %cst_31 {dimension_numbers = #tpu.dot_dimension_numbers<[1], [0], [0], [1], [0, 0, 1, 1], [], []>} : vector<128x32xf32>, vector<32x128xf32>, vector<128x128xf32> -> vector<128x128xf32>
    %cst_32 = arith.constant dense<0.000000e+00> : vector<128x128xf32>
    %53 = tpu.matmul %48, %52, %cst_32 {dimension_numbers = #tpu.dot_dimension_numbers<[1], [0], [0], [1], [0, 0, 1, 1], [], []>} : vector<128x128xf32>, vector<128x128xf32>, vector<128x128xf32> -> vector<128x128xf32>
    %c4_33 = arith.constant 4 : index
    %c0_34 = arith.constant 0 : index
    %54 = vector.load %arg3[%c4_33, %c0_34] : memref<12x128xf32, #tpu.memory_space<vmem>>, vector<1x128xf32>
    %55 = vector.broadcast %54 : vector<1x128xf32> to vector<128x128xf32>
    %56 = arith.addf %53, %55 : vector<128x128xf32>
    %cst_35 = arith.constant 0.000000e+00 : f32
    %57 = vector.broadcast %cst_35 : f32 to vector<128x128xf32>
    %58 = arith.maximumf %56, %57 : vector<128x128xf32>
    %59 = vector.extract_strided_slice %58 {offsets = [0, 0], sizes = [128, 32], strides = [1, 1]} : vector<128x128xf32> to vector<128x32xf32>
    %c5 = arith.constant 5 : index
    %c0_36 = arith.constant 0 : index
    %c0_37 = arith.constant 0 : index
    %60 = vector.load %arg2[%c5, %c0_36, %c0_37] : memref<12x32x128xf32, #tpu.memory_space<vmem>>, vector<1x32x128xf32>
    %61 = vector.shape_cast %60 : vector<1x32x128xf32> to vector<32x128xf32>
    %cst_38 = arith.constant dense<0.000000e+00> : vector<128x128xf32>
    %62 = tpu.matmul %59, %61, %cst_38 {dimension_numbers = #tpu.dot_dimension_numbers<[1], [0], [0], [1], [0, 0, 1, 1], [], []>} : vector<128x32xf32>, vector<32x128xf32>, vector<128x128xf32> -> vector<128x128xf32>
    %cst_39 = arith.constant dense<0.000000e+00> : vector<128x128xf32>
    %63 = tpu.matmul %48, %62, %cst_39 {dimension_numbers = #tpu.dot_dimension_numbers<[1], [0], [0], [1], [0, 0, 1, 1], [], []>} : vector<128x128xf32>, vector<128x128xf32>, vector<128x128xf32> -> vector<128x128xf32>
    %c5_40 = arith.constant 5 : index
    %c0_41 = arith.constant 0 : index
    %64 = vector.load %arg3[%c5_40, %c0_41] : memref<12x128xf32, #tpu.memory_space<vmem>>, vector<1x128xf32>
    %65 = vector.broadcast %64 : vector<1x128xf32> to vector<128x128xf32>
    %66 = arith.addf %63, %65 : vector<128x128xf32>
    %cst_42 = arith.constant 0.000000e+00 : f32
    %67 = vector.broadcast %cst_42 : f32 to vector<128x128xf32>
    %68 = arith.maximumf %66, %67 : vector<128x128xf32>
    %69 = vector.extract_strided_slice %68 {offsets = [0, 0], sizes = [128, 32], strides = [1, 1]} : vector<128x128xf32> to vector<128x32xf32>
    %c6 = arith.constant 6 : index
    %c0_43 = arith.constant 0 : index
    %c0_44 = arith.constant 0 : index
    %70 = vector.load %arg2[%c6, %c0_43, %c0_44] : memref<12x32x128xf32, #tpu.memory_space<vmem>>, vector<1x32x128xf32>
    %71 = vector.shape_cast %70 : vector<1x32x128xf32> to vector<32x128xf32>
    %cst_45 = arith.constant dense<0.000000e+00> : vector<128x128xf32>
    %72 = tpu.matmul %69, %71, %cst_45 {dimension_numbers = #tpu.dot_dimension_numbers<[1], [0], [0], [1], [0, 0, 1, 1], [], []>} : vector<128x32xf32>, vector<32x128xf32>, vector<128x128xf32> -> vector<128x128xf32>
    %cst_46 = arith.constant dense<0.000000e+00> : vector<128x128xf32>
    %73 = tpu.matmul %48, %72, %cst_46 {dimension_numbers = #tpu.dot_dimension_numbers<[1], [0], [0], [1], [0, 0, 1, 1], [], []>} : vector<128x128xf32>, vector<128x128xf32>, vector<128x128xf32> -> vector<128x128xf32>
    %c6_47 = arith.constant 6 : index
    %c0_48 = arith.constant 0 : index
    %74 = vector.load %arg3[%c6_47, %c0_48] : memref<12x128xf32, #tpu.memory_space<vmem>>, vector<1x128xf32>
    %75 = vector.broadcast %74 : vector<1x128xf32> to vector<128x128xf32>
    %76 = arith.addf %73, %75 : vector<128x128xf32>
    %cst_49 = arith.constant 0.000000e+00 : f32
    %77 = vector.broadcast %cst_49 : f32 to vector<128x128xf32>
    %78 = arith.maximumf %76, %77 : vector<128x128xf32>
    %79 = vector.extract_strided_slice %78 {offsets = [0, 0], sizes = [128, 32], strides = [1, 1]} : vector<128x128xf32> to vector<128x32xf32>
    %c7 = arith.constant 7 : index
    %c0_50 = arith.constant 0 : index
    %c0_51 = arith.constant 0 : index
    %80 = vector.load %arg2[%c7, %c0_50, %c0_51] : memref<12x32x128xf32, #tpu.memory_space<vmem>>, vector<1x32x128xf32>
    %81 = vector.shape_cast %80 : vector<1x32x128xf32> to vector<32x128xf32>
    %cst_52 = arith.constant dense<0.000000e+00> : vector<128x128xf32>
    %82 = tpu.matmul %79, %81, %cst_52 {dimension_numbers = #tpu.dot_dimension_numbers<[1], [0], [0], [1], [0, 0, 1, 1], [], []>} : vector<128x32xf32>, vector<32x128xf32>, vector<128x128xf32> -> vector<128x128xf32>
    %cst_53 = arith.constant dense<0.000000e+00> : vector<128x128xf32>
    %83 = tpu.matmul %48, %82, %cst_53 {dimension_numbers = #tpu.dot_dimension_numbers<[1], [0], [0], [1], [0, 0, 1, 1], [], []>} : vector<128x128xf32>, vector<128x128xf32>, vector<128x128xf32> -> vector<128x128xf32>
    %c7_54 = arith.constant 7 : index
    %c0_55 = arith.constant 0 : index
    %84 = vector.load %arg3[%c7_54, %c0_55] : memref<12x128xf32, #tpu.memory_space<vmem>>, vector<1x128xf32>
    %85 = vector.broadcast %84 : vector<1x128xf32> to vector<128x128xf32>
    %86 = arith.addf %83, %85 : vector<128x128xf32>
    %cst_56 = arith.constant 0.000000e+00 : f32
    %87 = vector.broadcast %cst_56 : f32 to vector<128x128xf32>
    %88 = arith.maximumf %86, %87 : vector<128x128xf32>
    %89 = vector.extract_strided_slice %88 {offsets = [0, 0], sizes = [128, 32], strides = [1, 1]} : vector<128x128xf32> to vector<128x32xf32>
    %c8 = arith.constant 8 : index
    %c0_57 = arith.constant 0 : index
    %c0_58 = arith.constant 0 : index
    %90 = vector.load %arg2[%c8, %c0_57, %c0_58] : memref<12x32x128xf32, #tpu.memory_space<vmem>>, vector<1x32x128xf32>
    %91 = vector.shape_cast %90 : vector<1x32x128xf32> to vector<32x128xf32>
    %cst_59 = arith.constant dense<0.000000e+00> : vector<128x128xf32>
    %92 = tpu.matmul %89, %91, %cst_59 {dimension_numbers = #tpu.dot_dimension_numbers<[1], [0], [0], [1], [0, 0, 1, 1], [], []>} : vector<128x32xf32>, vector<32x128xf32>, vector<128x128xf32> -> vector<128x128xf32>
    %cst_60 = arith.constant dense<0.000000e+00> : vector<128x128xf32>
    %93 = tpu.matmul %48, %92, %cst_60 {dimension_numbers = #tpu.dot_dimension_numbers<[1], [0], [0], [1], [0, 0, 1, 1], [], []>} : vector<128x128xf32>, vector<128x128xf32>, vector<128x128xf32> -> vector<128x128xf32>
    %c8_61 = arith.constant 8 : index
    %c0_62 = arith.constant 0 : index
    %94 = vector.load %arg3[%c8_61, %c0_62] : memref<12x128xf32, #tpu.memory_space<vmem>>, vector<1x128xf32>
    %95 = vector.broadcast %94 : vector<1x128xf32> to vector<128x128xf32>
    %96 = arith.addf %93, %95 : vector<128x128xf32>
    %cst_63 = arith.constant 0.000000e+00 : f32
    %97 = vector.broadcast %cst_63 : f32 to vector<128x128xf32>
    %98 = arith.maximumf %96, %97 : vector<128x128xf32>
    %99 = vector.extract_strided_slice %98 {offsets = [0, 0], sizes = [128, 32], strides = [1, 1]} : vector<128x128xf32> to vector<128x32xf32>
    %c9 = arith.constant 9 : index
    %c0_64 = arith.constant 0 : index
    %c0_65 = arith.constant 0 : index
    %100 = vector.load %arg2[%c9, %c0_64, %c0_65] : memref<12x32x128xf32, #tpu.memory_space<vmem>>, vector<1x32x128xf32>
    %101 = vector.shape_cast %100 : vector<1x32x128xf32> to vector<32x128xf32>
    %cst_66 = arith.constant dense<0.000000e+00> : vector<128x128xf32>
    %102 = tpu.matmul %99, %101, %cst_66 {dimension_numbers = #tpu.dot_dimension_numbers<[1], [0], [0], [1], [0, 0, 1, 1], [], []>} : vector<128x32xf32>, vector<32x128xf32>, vector<128x128xf32> -> vector<128x128xf32>
    %cst_67 = arith.constant dense<0.000000e+00> : vector<128x128xf32>
    %103 = tpu.matmul %48, %102, %cst_67 {dimension_numbers = #tpu.dot_dimension_numbers<[1], [0], [0], [1], [0, 0, 1, 1], [], []>} : vector<128x128xf32>, vector<128x128xf32>, vector<128x128xf32> -> vector<128x128xf32>
    %c9_68 = arith.constant 9 : index
    %c0_69 = arith.constant 0 : index
    %104 = vector.load %arg3[%c9_68, %c0_69] : memref<12x128xf32, #tpu.memory_space<vmem>>, vector<1x128xf32>
    %105 = vector.broadcast %104 : vector<1x128xf32> to vector<128x128xf32>
    %106 = arith.addf %103, %105 : vector<128x128xf32>
    %cst_70 = arith.constant 0.000000e+00 : f32
    %107 = vector.broadcast %cst_70 : f32 to vector<128x128xf32>
    %108 = arith.maximumf %106, %107 : vector<128x128xf32>
    %109 = vector.extract_strided_slice %108 {offsets = [0, 0], sizes = [128, 32], strides = [1, 1]} : vector<128x128xf32> to vector<128x32xf32>
    %c10 = arith.constant 10 : index
    %c0_71 = arith.constant 0 : index
    %c0_72 = arith.constant 0 : index
    %110 = vector.load %arg2[%c10, %c0_71, %c0_72] : memref<12x32x128xf32, #tpu.memory_space<vmem>>, vector<1x32x128xf32>
    %111 = vector.shape_cast %110 : vector<1x32x128xf32> to vector<32x128xf32>
    %cst_73 = arith.constant dense<0.000000e+00> : vector<128x128xf32>
    %112 = tpu.matmul %109, %111, %cst_73 {dimension_numbers = #tpu.dot_dimension_numbers<[1], [0], [0], [1], [0, 0, 1, 1], [], []>} : vector<128x32xf32>, vector<32x128xf32>, vector<128x128xf32> -> vector<128x128xf32>
    %c10_74 = arith.constant 10 : index
    %c0_75 = arith.constant 0 : index
    %113 = vector.load %arg3[%c10_74, %c0_75] : memref<12x128xf32, #tpu.memory_space<vmem>>, vector<1x128xf32>
    %114 = vector.broadcast %113 : vector<1x128xf32> to vector<128x128xf32>
    %115 = arith.addf %112, %114 : vector<128x128xf32>
    %cst_76 = arith.constant 0.000000e+00 : f32
    %116 = vector.broadcast %cst_76 : f32 to vector<128x128xf32>
    %117 = arith.maximumf %115, %116 : vector<128x128xf32>
    %118 = vector.extract_strided_slice %117 {offsets = [0, 0], sizes = [128, 32], strides = [1, 1]} : vector<128x128xf32> to vector<128x32xf32>
    %c11 = arith.constant 11 : index
    %c0_77 = arith.constant 0 : index
    %c0_78 = arith.constant 0 : index
    %119 = vector.load %arg2[%c11, %c0_77, %c0_78] : memref<12x32x128xf32, #tpu.memory_space<vmem>>, vector<1x32x128xf32>
    %120 = vector.shape_cast %119 : vector<1x32x128xf32> to vector<32x128xf32>
    %cst_79 = arith.constant dense<0.000000e+00> : vector<128x128xf32>
    %121 = tpu.matmul %118, %120, %cst_79 {dimension_numbers = #tpu.dot_dimension_numbers<[1], [0], [0], [1], [0, 0, 1, 1], [], []>} : vector<128x32xf32>, vector<32x128xf32>, vector<128x128xf32> -> vector<128x128xf32>
    %c11_80 = arith.constant 11 : index
    %c0_81 = arith.constant 0 : index
    %122 = vector.load %arg3[%c11_80, %c0_81] : memref<12x128xf32, #tpu.memory_space<vmem>>, vector<1x128xf32>
    %123 = vector.broadcast %122 : vector<1x128xf32> to vector<128x128xf32>
    %124 = arith.addf %121, %123 : vector<128x128xf32>
    %c0_82 = arith.constant 0 : index
    %c0_83 = arith.constant 0 : index
    %125 = vector.load %arg4[%c0_82, %c0_83] : memref<128x128xf32, #tpu.memory_space<vmem>>, vector<128x128xf32>
    tpu.vector_store %arg4[%c0_82, %c0_83], %124 {strides = array<i32>} : memref<128x128xf32, #tpu.memory_space<vmem>>, vector<128x128xf32>,
    return
  }
}

</mosaic_0001>

<bundles_post_ra>
// kernel: net_separate_forward.1
= control target key start
LH: loop header
LB: loop body
LE: loop exit
PB: predicated region body
PF: predicated region fallthrough
CT: control target
= control target key end

     0   :  { %vm42_vm0 = vcmask 261120   ;;  %v5404_v37 = vmov 4   ;;  %v5405_v38 = vmov 0   ;;  %v5406_v41 = vmov 3   ;;  %s6443_s2 = inlined_call_operand.vmem [shape: f32[12,32,128], index: 2, kind: input, shape index: {}]   ;;  %s6444_s0 = inlined_call_operand.vmem [shape: f32[128,128], index: 0, kind: input, shape index: {}]   ;;  %s6445_s3 = inlined_call_operand.vmem [shape: f32[12,128], index: 3, kind: input, shape index: {}]   ;;  %s6446_s1 = inlined_call_operand.vmem [shape: f32[128,128], index: 1, kind: input, shape index: {}]   ;;  %s6447_s4 = inlined_call_operand.vmem [shape: f32[128,128], index: 4, kind: output, shape index: {}]  }
   0x1   :  { %v33_v0 = vld [vmem:[%s6443_s2] sm:$0xff]  ;;  %v34_v1 = vld [vmem:[%s6443_s2 + $0x8] sm:$0xff]  ;;  %v35_v2 = vld [vmem:[%s6443_s2 + $0x10] sm:$0xff]  ;;  %5370 = vset.pattern.permute.xlu1 %v5404_v37  ;;  %5372 = vset.pattern.permute.xlu0 %v5404_v37 }
   0x2   :  { %v5079_v3 = vpack.c.bf16 %v34_v1, %v33_v0  ;;  %v36_v4 = vld [vmem:[%s6443_s2 + $0x18] sm:$0xff]  ;;  %v5447_v5 = vld [vmem:[%s6444_s0] sm:$0xff]  ;;  %v3718_v8 = vld [vmem:[%s6443_s2 + $0x48] sm:$0xff] }
   0x3   :  { %v5083_v6 = vpack.c.bf16 %v36_v4, %v35_v2  ;;  %4367 = vmatprep.mubr.msk.f32.mxu0 %vm42_vm0, %v5447_v5  ;;  %v3717_v7 = vld [vmem:[%s6443_s2 + $0x40] sm:$0xff]  ;;  %v3719_v10 = vld [vmem:[%s6443_s2 + $0x50] sm:$0xff]  ;;  %v3720_v11 = vld [vmem:[%s6443_s2 + $0x58] sm:$0xff]  ;;  %vm829_vm1 = vcmp.gt.f32.partialorder %v5447_v5, 0.5 }
   0x4   :  { %5080 = vmatprep.subr.bf16.mxu0 %v5079_v3  ;;  %v5095_v9 = vpack.c.bf16 %v3718_v8, %v3717_v7  ;;  %v5466_v12 = vld [vmem:[%s6444_s0 + $0x8] sm:$0xff]  ;;  %v3696_v13 = vld [vmem:[%s6443_s2 + $0x20] sm:$0xff]  ;;  %v5477_v15 = vld [vmem:[%s6444_s0 + $0x10] sm:$0xff]  ;;  %v5099_v16 = vpack.c.bf16 %v3720_v11, %v3719_v10  ;;  %v845_v39 = vsel %vm829_vm1, 1, %v5405_v38 }
   0x5   :  { %5082 = vmatpush3.bf16.msra.mxu0 %v5079_v3  ;;  %v3697_v14 = vld [vmem:[%s6443_s2 + $0x28] sm:$0xff]  ;;  %v5486_v18 = vld [vmem:[%s6444_s0 + $0x18] sm:$0xff]  ;;  %v5491_v19 = vld [vmem:[%s6444_s0 + $0x20] sm:$0xff]  ;;  %942 = vperm.xlu1 %5370, %v845_v39   ;;  %vm830_vm2 = vcmp.gt.f32.partialorder %v5466_v12, 0.5  ;;  %vm831_vm6 = vcmp.gt.f32.partialorder %v5477_v15, 0.5 }
   0x6   :  { %5084 = vmatprep.subr.bf16.mxu0 %v5083_v6  ;;  %v5087_v17 = vpack.c.bf16 %v3697_v14, %v3696_v13  ;;  %v5500_v20 = vld [vmem:[%s6444_s0 + $0x28] sm:$0xff]  ;;  %v5505_v21 = vld [vmem:[%s6444_s0 + $0x30] sm:$0xff]  ;;  %v5514_v22 = vld [vmem:[%s6444_s0 + $0x38] sm:$0xff]  ;;  %v846_v40 = vsel %vm830_vm2, 1, %v5405_v38  ;;  %vm832_vm3 = vcmp.gt.f32.partialorder %v5486_v18, 0.5  ;;  %vm833_vm4 = vcmp.gt.f32.partialorder %v5491_v19, 0.5 }
   0x7   :  { %v5519_v23 = vld [vmem:[%s6444_s0 + $0x40] sm:$0xff]  ;;  %v5528_v24 = vld [vmem:[%s6444_s0 + $0x48] sm:$0xff]  ;;  %v5533_v25 = vld [vmem:[%s6444_s0 + $0x50] sm:$0xff]  ;;  %v848_v42 = vsel %vm832_vm3, 1, %v5405_v38  ;;  %v849_v43 = vsel %vm833_vm4, 1, %v5405_v38  ;;  %vm834_vm5 = vcmp.gt.f32.partialorder %v5500_v20, 0.5 }
   0x8   :  { %5088 = vmatprep.subr.bf16.mxu1 %v5087_v17  ;;  %v5542_v26 = vld [vmem:[%s6444_s0 + $0x58] sm:$0xff]  ;;  %v5547_v27 = vld [vmem:[%s6444_s0 + $0x60] sm:$0xff]  ;;  %v5556_v28 = vld [vmem:[%s6444_s0 + $0x68] sm:$0xff]  ;;  %v850_v44 = vsel %vm834_vm5, 1, %v5405_v38  ;;  %vm836_vm7 = vcmp.gt.f32.partialorder %v5514_v22, 0.5  ;;  %vm835_vm8 = vcmp.gt.f32.partialorder %v5505_v21, 0.5 }
   0x9   :  { %5086 = vmatpush3.bf16.msra.mxu0 %v5083_v6  ;;  %5090 = vmatpush3.bf16.msra.mxu1 %v5087_v17  ;;  %v5561_v29 = vld [vmem:[%s6444_s0 + $0x70] sm:$0xff]  ;;  %v5570_v30 = vld [vmem:[%s6444_s0 + $0x78] sm:$0xff]  ;;  %v3738_v34 = vld [vmem:[%s6443_s2 + $0x60] sm:$0xff]  ;;  %v847_v45 = vsel %vm831_vm6, 1, %v5405_v38  ;;  %v852_v46 = vsel %vm836_vm7, 1, %v5405_v38  ;;  %v851_v47 = vsel %vm835_vm8, 1, %v5405_v38 }
   0xa   :  { %5096 = vmatprep.subr.bf16.mxu0 %v5095_v9  ;;  %v3698_v31 = vld [vmem:[%s6443_s2 + $0x30] sm:$0xff]  ;;  %v3699_v32 = vld [vmem:[%s6443_s2 + $0x38] sm:$0xff]  ;;  %v3739_v35 = vld [vmem:[%s6443_s2 + $0x68] sm:$0xff]  ;;  %945 = vperm.xlu1 %5370, %v846_v40   ;;  %vm839_vm9 = vcmp.gt.f32.partialorder %v5533_v25, 0.5  ;;  %vm837_vm10 = vcmp.gt.f32.partialorder %v5519_v23, 0.5  ;;  %vm838_vm11 = vcmp.gt.f32.partialorder %v5528_v24, 0.5 }
   0xb   :  { %v5091_v33 = vpack.c.bf16 %v3699_v32, %v3698_v31  ;;  %v5618_v36 = vpack.c.bf16 %v3739_v35, %v3738_v34  ;;  %948 = vperm.xlu0 %5372, %v847_v45   ;;  %v855_v48 = vsel %vm839_vm9, 1, %v5405_v38  ;;  %v853_v49 = vsel %vm837_vm10, 1, %v5405_v38  ;;  %v5674_v56 = vld [vmem:[%s6445_s3] ss:$0 sm:$0xff]  ;;  %v3740_v61 = vld [vmem:[%s6443_s2 + $0x70] sm:$0xff]  ;;  %v3741_v62 = vld [vmem:[%s6443_s2 + $0x78] sm:$0xff] }
   0xc   :  { %4368 = vmatmul.mubr.msk.f32.vlgmr.msra.gmra.mrb[0].mxu0 %vm42_vm0, %v5466_v12  ;;  %v854_v50 = vsel %vm838_vm11, 1, %v5405_v38  ;;  %vm840_vm12 = vcmp.gt.f32.partialorder %v5542_v26, 0.5  ;;  %vm841_vm13 = vcmp.gt.f32.partialorder %v5547_v27, 0.5  ;;  %vm842_vm14 = vcmp.gt.f32.partialorder %v5556_v28, 0.5 }
   0xd   :  { %5098 = vmatpush3.bf16.msra.mxu0 %v5095_v9  ;;  %4370 = vmatprep.mubr.msk.f32.mxu0 %vm42_vm0, %v5477_v15  ;;  %v856_v51 = vsel %vm840_vm12, 1, %v5405_v38  ;;  %v857_v52 = vsel %vm841_vm13, 1, %v5405_v38  ;;  %v858_v53 = vsel %vm842_vm14, 1, %v5405_v38  ;;  %vm843_vm15 = vcmp.gt.f32.partialorder %v5561_v29, 0.5 }
   0xe   :  { %5100 = vmatprep.subr.bf16.mxu0 %v5099_v16  ;;  %5092 = vmatprep.subr.bf16.mxu1 %v5091_v33  ;;  %v859_v54 = vsel %vm843_vm15, 1, %v5405_v38  ;;  %vm844_vm1 = vcmp.gt.f32.partialorder %v5570_v30, 0.5  ;;  %v5107_v4 = vpack.c.bf16 %v3741_v62, %v3740_v61 }
   0xf   :  { %5094 = vmatpush3.bf16.msra.mxu1 %v5091_v33  ;;  %5371 = vset.pattern.permute.xlu1 %v5406_v41  ;;  %v860_v55 = vsel %vm844_vm1, 1, %v5405_v38 }
  0x10   :  { %4371 = vmatmul.mubr.msk.f32.gmra.mrb[2].mxu0 %vm42_vm0, %v5486_v18  ;;  %5104 = vmatprep.subr.bf16.mxu1 %v5618_v36 }
  0x11   :  { %4373 = vmatprep.mubr.msk.f32.mxu0 %vm42_vm0, %v5491_v19  ;;  %5102 = vmatpush3.bf16.msra.mxu0 %v5099_v16 }
  0x12   :  { %871 = vperm.xlu1 %5371, %v848_v42   ;;  %960 = vperm.xlu0 %5372, %v851_v47  }
  0x14   :  { %4374 = vmatmul.mubr.msk.f32.gmra.mrb[4].mxu0 %vm42_vm0, %v5500_v20 }
  0x15   :  { %4376 = vmatprep.mubr.msk.f32.mxu0 %vm42_vm0, %v5505_v21 }
  0x16   :  { %5373 = vset.pattern.permute.xlu1 %v5404_v37  ;;  %972 = vperm.xlu0 %5372, %v855_v48  }
  0x17   :  { %951 = vperm.xlu1 %5373, %v848_v42   ;;  %v5715_v42 = vld [vmem:[%s6445_s3 + $0x2] ss:$0 sm:$0xff] }
  0x18   :  { %4377 = vmatmul.mubr.msk.f32.gmra.mrb[6].mxu0 %vm42_vm0, %v5514_v22 }
  0x19   :  { %4379 = vmatprep.mubr.msk.f32.mxu0 %vm42_vm0, %v5519_v23 }
  0x1a   :  { %5381 = vset.pattern.permute.xlu0 %v5406_v41 }
  0x1b   :  { %5374 = vset.pattern.permute.xlu1 %v5406_v41  ;;  %862 = vperm.xlu0 %5381, %v845_v39  }
  0x1c   :  { %4380 = vmatmul.mubr.msk.f32.gmra.mrb[8].mxu0 %vm42_vm0, %v5528_v24  ;;  %874 = vperm.xlu1 %5374, %v849_v43  }
  0x1d   :  { %4382 = vmatprep.mubr.msk.f32.mxu0 %vm42_vm0, %v5533_v25 }
  0x1f   :  { %865 = vperm.xlu0 %5381, %v846_v40  }
  0x20   :  { %4383 = vmatmul.mubr.msk.f32.gmra.mrb[10].mxu0 %vm42_vm0, %v5542_v26  ;;  %5375 = vset.pattern.permute.xlu1 %v5404_v37 }
  0x21   :  { %4385 = vmatprep.mubr.msk.f32.mxu0 %vm42_vm0, %v5547_v27  ;;  %954 = vperm.xlu1 %5375, %v849_v43  }
  0x23   :  { %868 = vperm.xlu0 %5381, %v847_v45  }
  0x24   :  { %4386 = vmatmul.mubr.msk.f32.gmra.mrb[12].mxu0 %vm42_vm0, %v5556_v28 }
  0x25   :  { %4388 = vmatprep.mubr.msk.f32.mxu0 %vm42_vm0, %v5561_v29  ;;  %957 = vperm.xlu1 %5375, %v850_v44  }
  0x27   :  { %877 = vperm.xlu0 %5381, %v850_v44  }
  0x28   :  { %4389 = vmatmul.mubr.msk.f32.gmra.mrb[14].mxu0 %vm42_vm0, %v5570_v30 }
  0x29   :  { %4431 = vmatprep.mubr.msk.f32.mxu0 %vm42_vm0, %v5447_v5  ;;  %5376 = vset.pattern.permute.xlu1 %v5406_v41 }
  0x2a   :  { %883 = vperm.xlu1 %5376, %v852_v46  }
  0x2b   :  { %880 = vperm.xlu0 %5381, %v851_v47  }
  0x2c   :  { %4432 = vmatmul.mubr.msk.f32.vlgmr.msra.gmra.mrb[16].mxu0 %vm42_vm0, %v5466_v12 }
  0x2d   :  { %4434 = vmatprep.mubr.msk.f32.mxu0 %vm42_vm0, %v5477_v15 }
  0x2e   :  { %5377 = vset.pattern.permute.xlu1 %v5404_v37 }
  0x2f   :  { %963 = vperm.xlu1 %5377, %v852_v46   ;;  %889 = vperm.xlu0 %5381, %v854_v50  }
  0x30   :  { %4435 = vmatmul.mubr.msk.f32.gmra.mrb[18].mxu0 %vm42_vm0, %v5486_v18 }
  0x31   :  { %4437 = vmatprep.mubr.msk.f32.mxu0 %vm42_vm0, %v5491_v19 }
  0x33   :  { %5378 = vset.pattern.permute.xlu1 %v5406_v41  ;;  %892 = vperm.xlu0 %5381, %v855_v48  }
  0x34   :  { %4438 = vmatmul.mubr.msk.f32.gmra.mrb[20].mxu0 %vm42_vm0, %v5500_v20  ;;  %886 = vperm.xlu1 %5378, %v853_v49  }
  0x35   :  { %4440 = vmatprep.mubr.msk.f32.mxu0 %vm42_vm0, %v5505_v21 }
  0x37   :  { %901 = vperm.xlu0 %5381, %v858_v53  }
  0x38   :  { %4441 = vmatmul.mubr.msk.f32.gmra.mrb[22].mxu0 %vm42_vm0, %v5514_v22  ;;  %5379 = vset.pattern.permute.xlu1 %v5404_v37 }
  0x39   :  { %4443 = vmatprep.mubr.msk.f32.mxu0 %vm42_vm0, %v5519_v23  ;;  %966 = vperm.xlu1 %5379, %v853_v49  }
  0x3b   :  { %904 = vperm.xlu0 %5381, %v859_v54  }
  0x3c   :  { %4444 = vmatmul.mubr.msk.f32.gmra.mrb[24].mxu0 %vm42_vm0, %v5528_v24 }
  0x3d   :  { %4446 = vmatprep.mubr.msk.f32.mxu0 %vm42_vm0, %v5533_v25  ;;  %969 = vperm.xlu1 %5379, %v854_v50  }
  0x3f   :  { %5386 = vset.pattern.permute.xlu0 %v5404_v37 }
  0x40   :  { %4447 = vmatmul.mubr.msk.f32.gmra.mrb[26].mxu0 %vm42_vm0, %v5542_v26  ;;  %984 = vperm.xlu0 %5386, %v859_v54  }
  0x41   :  { %4449 = vmatprep.mubr.msk.f32.mxu0 %vm42_vm0, %v5547_v27  ;;  %5380 = vset.pattern.permute.xlu1 %v5406_v41 }
  0x42   :  { %895 = vperm.xlu1 %5380, %v856_v51  }
  0x44   :  { %4450 = vmatmul.mubr.msk.f32.gmra.mrb[28].mxu0 %vm42_vm0, %v5556_v28 }
  0x45   :  { %4452 = vmatprep.mubr.msk.f32.mxu0 %vm42_vm0, %v5561_v29 }
  0x46   :  { %5382 = vset.pattern.permute.xlu1 %v5404_v37 }
  0x47   :  { %975 = vperm.xlu1 %5382, %v856_v51  }
  0x48   :  { %4453 = vmatmul.mubr.msk.f32.gmra.mrb[30].mxu0 %vm42_vm0, %v5570_v30 }
  0x4b   :  { %5383 = vset.pattern.permute.xlu1 %v5406_v41 }
  0x4c   :  { %898 = vperm.xlu1 %5383, %v857_v52  }
  0x50   :  { %5384 = vset.pattern.permute.xlu1 %v5404_v37 }
  0x51   :  { %978 = vperm.xlu1 %5384, %v857_v52  }
  0x55   :  { %981 = vperm.xlu1 %5384, %v858_v53  }
  0x59   :  { %5385 = vset.pattern.permute.xlu1 %v5406_v41 }
  0x5a   :  { %907 = vperm.xlu1 %5385, %v860_v55  }
  0x5e   :  { %5387 = vset.pattern.permute.xlu1 %v5404_v37 }
  0x5f   :  { %987 = vperm.xlu1 %5387, %v860_v55  }
  0xdf   :  { %v4369_v57 = vpop.f32.mrb[0].mxu0 }
  0xe0   :  { %v163_v58 = vadd.f32 %v4369_v57, %v5674_v56  ;;  %v157_v59 = vpop.f32.mrb[1].mxu0 }
  0xe1   :  { %v158_v60 = vadd.f32 %v5674_v56, %v157_v59 }
  0xe2   :  { %v237_v1 = vmax.f32 %v163_v58, 0.0 }
  0xe3   :  { %v236_v63 = vmax.f32 %v158_v60, 0.0  ;;  %v4372_v0 = vpop.f32.mrb[2].mxu0 }
  0xe4   :  { %v173_v2 = vadd.f32 %v4372_v0, %v5674_v56  ;;  %v167_v3 = vpop.f32.mrb[3].mxu0 }
  0xe5   :  { %v168_v5 = vadd.f32 %v5674_v56, %v167_v3  ;;  %4399 = vmatprep.mubr.msk.f32.mxu1 %vm42_vm0, %v236_v63 }
  0xe6   :  { %4400 = vmatmul.mubr.msk.f32.vlgmr.msra.gmra.mrb[0].mxu1 %vm42_vm0, %v237_v1  ;;  %v239_v8 = vmax.f32 %v173_v2, 0.0 }
  0xe7   :  { %v238_v6 = vmax.f32 %v168_v5, 0.0  ;;  %v4375_v7 = vpop.f32.mrb[4].mxu0  ;;  %5106 = vmatpush3.bf16.msra.mxu1 %v5618_v36 }
  0xe8   :  { %v183_v9 = vadd.f32 %v4375_v7, %v5674_v56  ;;  %v177_v10 = vpop.f32.mrb[5].mxu0  ;;  %5108 = vmatprep.subr.bf16.mxu1 %v5107_v4 }
  0xe9   :  { %v178_v11 = vadd.f32 %v5674_v56, %v177_v10  ;;  %4402 = vmatprep.mubr.msk.f32.mxu1 %vm42_vm0, %v238_v6 }
  0xea   :  { %4403 = vmatmul.mubr.msk.f32.gmra.mrb[2].mxu1 %vm42_vm0, %v239_v8  ;;  %v241_v14 = vmax.f32 %v183_v9, 0.0 }
  0xeb   :  { %v240_v12 = vmax.f32 %v178_v11, 0.0  ;;  %v4378_v13 = vpop.f32.mrb[6].mxu0  ;;  %5110 = vmatpush3.bf16.msra.mxu1 %v5107_v4 }
  0xec   :  { %v193_v15 = vadd.f32 %v4378_v13, %v5674_v56  ;;  %v187_v16 = vpop.f32.mrb[7].mxu0 }
  0xed   :  { %v188_v17 = vadd.f32 %v5674_v56, %v187_v16  ;;  %4405 = vmatprep.mubr.msk.f32.mxu1 %vm42_vm0, %v240_v12 }
  0xee   :  { %4406 = vmatmul.mubr.msk.f32.gmra.mrb[4].mxu1 %vm42_vm0, %v241_v14  ;;  %v243_v20 = vmax.f32 %v193_v15, 0.0 }
  0xef   :  { %v242_v18 = vmax.f32 %v188_v17, 0.0  ;;  %v4381_v19 = vpop.f32.mrb[8].mxu0 }
  0xf0   :  { %v203_v21 = vadd.f32 %v4381_v19, %v5674_v56  ;;  %v197_v22 = vpop.f32.mrb[9].mxu0 }
  0xf1   :  { %v198_v23 = vadd.f32 %v5674_v56, %v197_v22  ;;  %4408 = vmatprep.mubr.msk.f32.mxu1 %vm42_vm0, %v242_v18 }
  0xf2   :  { %4409 = vmatmul.mubr.msk.f32.gmra.mrb[6].mxu1 %vm42_vm0, %v243_v20  ;;  %v245_v26 = vmax.f32 %v203_v21, 0.0 }
  0xf3   :  { %v244_v24 = vmax.f32 %v198_v23, 0.0  ;;  %v4384_v25 = vpop.f32.mrb[10].mxu0 }
  0xf4   :  { %v213_v27 = vadd.f32 %v4384_v25, %v5674_v56  ;;  %v207_v28 = vpop.f32.mrb[11].mxu0 }
  0xf5   :  { %v208_v29 = vadd.f32 %v5674_v56, %v207_v28  ;;  %4411 = vmatprep.mubr.msk.f32.mxu1 %vm42_vm0, %v244_v24 }
  0xf6   :  { %4412 = vmatmul.mubr.msk.f32.gmra.mrb[8].mxu1 %vm42_vm0, %v245_v26  ;;  %v247_v32 = vmax.f32 %v213_v27, 0.0 }
  0xf7   :  { %v246_v30 = vmax.f32 %v208_v29, 0.0  ;;  %v4387_v31 = vpop.f32.mrb[12].mxu0  ;;  %v3759_v29 = vld [vmem:[%s6443_s2 + $0x80] sm:$0xff] }
  0xf8   :  { %v223_v33 = vadd.f32 %v4387_v31, %v5674_v56  ;;  %v217_v34 = vpop.f32.mrb[13].mxu0 }
  0xf9   :  { %v218_v35 = vadd.f32 %v5674_v56, %v217_v34  ;;  %4414 = vmatprep.mubr.msk.f32.mxu1 %vm42_vm0, %v246_v30  ;;  %v3760_v30 = vld [vmem:[%s6443_s2 + $0x88] sm:$0xff] }
  0xfa   :  { %4415 = vmatmul.mubr.msk.f32.gmra.mrb[10].mxu1 %vm42_vm0, %v247_v32  ;;  %v249_v38 = vmax.f32 %v223_v33, 0.0  ;;  %v5111_v31 = vpack.c.bf16 %v3760_v30, %v3759_v29  ;;  %v3761_v32 = vld [vmem:[%s6443_s2 + $0x90] sm:$0xff]  ;;  %v3762_v33 = vld [vmem:[%s6443_s2 + $0x98] sm:$0xff] }
  0xfb   :  { %v248_v36 = vmax.f32 %v218_v35, 0.0  ;;  %v4390_v37 = vpop.f32.mrb[14].mxu0  ;;  %v5115_v34 = vpack.c.bf16 %v3762_v33, %v3761_v32  ;;  %v943_v35 = vpop.permute.xlu1 %942 }
  0xfc   :  { %v233_v39 = vadd.f32 %v4390_v37, %v5674_v56  ;;  %v227_v40 = vpop.f32.mrb[15].mxu0  ;;  %5112 = vmatprep.subr.bf16.mxu0 %v5111_v31  ;;  %vm989_vm5 = vcmp.eq.s32.totalorder %v943_v35, 1 }
  0xfd   :  { %v228_v41 = vadd.f32 %v5674_v56, %v227_v40  ;;  %4417 = vmatprep.mubr.msk.f32.mxu1 %vm42_vm0, %v248_v36  ;;  %5114 = vmatpush3.bf16.msra.mxu0 %v5111_v31 }
  0xfe   :  { %4418 = vmatmul.mubr.msk.f32.gmra.mrb[12].mxu1 %vm42_vm0, %v249_v38  ;;  %v251_v45 = vmax.f32 %v233_v39, 0.0  ;;  %5116 = vmatprep.subr.bf16.mxu0 %v5115_v34 }
  0xff   :  { %v250_v43 = vmax.f32 %v228_v41, 0.0  ;;  %v4433_v44 = vpop.f32.mrb[16].mxu0  ;;  %v946_v36 = vpop.permute.xlu1 %945 }
 0x100   :  { %v537_v46 = vadd.f32 %v4433_v44, %v5715_v42  ;;  %v531_v47 = vpop.f32.mrb[17].mxu0  ;;  %vm990_vm4 = vcmp.eq.s32.totalorder %v946_v36, 1 }
 0x101   :  { %v532_v48 = vadd.f32 %v5715_v42, %v531_v47  ;;  %4420 = vmatprep.mubr.msk.f32.mxu1 %vm42_vm0, %v250_v43  ;;  %5118 = vmatpush3.bf16.msra.mxu0 %v5115_v34 }
 0x102   :  { %4421 = vmatmul.mubr.msk.f32.gmra.mrb[14].mxu1 %vm42_vm0, %v251_v45  ;;  %v611_v51 = vmax.f32 %v537_v46, 0.0 }
 0x103   :  { %v610_v49 = vmax.f32 %v532_v48, 0.0  ;;  %v4436_v50 = vpop.f32.mrb[18].mxu0  ;;  %v5764_v37 = vpop.permute.xlu1 %871 }
 0x104   :  { %v547_v52 = vadd.f32 %v4436_v50, %v5715_v42  ;;  %v541_v53 = vpop.f32.mrb[19].mxu0  ;;  %vm912_vm6 = vcmp.eq.s32.totalorder %v5764_v37, 1 }
 0x105   :  { %v542_v54 = vadd.f32 %v5715_v42, %v541_v53  ;;  %4463 = vmatprep.mubr.msk.f32.mxu1 %vm42_vm0, %v610_v49 }
 0x106   :  { %4464 = vmatmul.mubr.msk.f32.vlgmr.msra.gmra.mrb[16].mxu1 %vm42_vm0, %v611_v51  ;;  %v613_v57 = vmax.f32 %v547_v52, 0.0 }
 0x107   :  { %v612_v55 = vmax.f32 %v542_v54, 0.0  ;;  %v4439_v56 = vpop.f32.mrb[20].mxu0  ;;  %v5766_v38 = vpop.permute.xlu1 %951 }
 0x108   :  { %v557_v58 = vadd.f32 %v4439_v56, %v5715_v42  ;;  %v551_v59 = vpop.f32.mrb[21].mxu0  ;;  %vm992_vm8 = vcmp.eq.s32.totalorder %v5766_v38, 1 }
 0x109   :  { %v552_v60 = vadd.f32 %v5715_v42, %v551_v59  ;;  %4466 = vmatprep.mubr.msk.f32.mxu1 %vm42_vm0, %v612_v55 }
 0x10a   :  { %4467 = vmatmul.mubr.msk.f32.gmra.mrb[18].mxu1 %vm42_vm0, %v613_v57  ;;  %v615_v63 = vmax.f32 %v557_v58, 0.0 }
 0x10b   :  { %v614_v61 = vmax.f32 %v552_v60, 0.0  ;;  %v4442_v62 = vpop.f32.mrb[22].mxu0  ;;  %v5768_v39 = vpop.permute.xlu1 %874 }
 0x10c   :  { %v567_v0 = vadd.f32 %v4442_v62, %v5715_v42  ;;  %v561_v1 = vpop.f32.mrb[23].mxu0  ;;  %vm913_vm11 = vcmp.eq.s32.totalorder %v5768_v39, 1 }
 0x10d   :  { %v562_v2 = vadd.f32 %v5715_v42, %v561_v1  ;;  %4469 = vmatprep.mubr.msk.f32.mxu1 %vm42_vm0, %v614_v61 }
 0x10e   :  { %4470 = vmatmul.mubr.msk.f32.gmra.mrb[20].mxu1 %vm42_vm0, %v615_v63  ;;  %v617_v5 = vmax.f32 %v567_v0, 0.0 }
 0x10f   :  { %v616_v3 = vmax.f32 %v562_v2, 0.0  ;;  %v4445_v4 = vpop.f32.mrb[24].mxu0  ;;  %v5770_v40 = vpop.permute.xlu1 %954 }
 0x110   :  { %v577_v6 = vadd.f32 %v4445_v4, %v5715_v42  ;;  %v571_v7 = vpop.f32.mrb[25].mxu0  ;;  %vm993_vm13 = vcmp.eq.s32.totalorder %v5770_v40, 1 }
 0x111   :  { %v572_v8 = vadd.f32 %v5715_v42, %v571_v7  ;;  %4472 = vmatprep.mubr.msk.f32.mxu1 %vm42_vm0, %v616_v3 }
 0x112   :  { %4473 = vmatmul.mubr.msk.f32.gmra.mrb[22].mxu1 %vm42_vm0, %v617_v5  ;;  %v619_v11 = vmax.f32 %v577_v6, 0.0  ;;  %v5811_v5 = vld [vmem:[%s6445_s3 + $0x1] ss:$0 sm:$0xff] }
 0x113   :  { %v618_v9 = vmax.f32 %v572_v8, 0.0  ;;  %v4448_v10 = vpop.f32.mrb[26].mxu0  ;;  %v5772_v41 = vpop.permute.xlu1 %957 }
 0x114   :  { %v587_v12 = vadd.f32 %v4448_v10, %v5715_v42  ;;  %v581_v13 = vpop.f32.mrb[27].mxu0  ;;  %vm994_vm12 = vcmp.eq.s32.totalorder %v5772_v41, 1 }
 0x115   :  { %v582_v14 = vadd.f32 %v5715_v42, %v581_v13  ;;  %4475 = vmatprep.mubr.msk.f32.mxu1 %vm42_vm0, %v618_v9 }
 0x116   :  { %4476 = vmatmul.mubr.msk.f32.gmra.mrb[24].mxu1 %vm42_vm0, %v619_v11  ;;  %v621_v17 = vmax.f32 %v587_v12, 0.0  ;;  %v5825_v11 = vld [vmem:[%s6445_s3 + $0x3] ss:$0 sm:$0xff] }
 0x117   :  { %v620_v15 = vmax.f32 %v582_v14, 0.0  ;;  %v4451_v16 = vpop.f32.mrb[28].mxu0  ;;  %v5776_v43 = vpop.permute.xlu1 %883 }
 0x118   :  { %v597_v18 = vadd.f32 %v4451_v16, %v5715_v42  ;;  %v591_v19 = vpop.f32.mrb[29].mxu0  ;;  %vm916_vm14 = vcmp.eq.s32.totalorder %v5776_v43, 1 }
 0x119   :  { %v592_v20 = vadd.f32 %v5715_v42, %v591_v19  ;;  %4478 = vmatprep.mubr.msk.f32.mxu1 %vm42_vm0, %v620_v15 }
 0x11a   :  { %4479 = vmatmul.mubr.msk.f32.gmra.mrb[26].mxu1 %vm42_vm0, %v621_v17  ;;  %v623_v23 = vmax.f32 %v597_v18, 0.0 }
 0x11b   :  { %v622_v21 = vmax.f32 %v592_v20, 0.0  ;;  %v4454_v22 = vpop.f32.mrb[30].mxu0  ;;  %v5780_v45 = vpop.permute.xlu1 %963 }
 0x11c   :  { %v607_v24 = vadd.f32 %v4454_v22, %v5715_v42  ;;  %v601_v25 = vpop.f32.mrb[31].mxu0 }
 0x11d   :  { %v602_v26 = vadd.f32 %v5715_v42, %v601_v25  ;;  %4481 = vmatprep.mubr.msk.f32.mxu1 %vm42_vm0, %v622_v21  ;;  %v5774_v42 = vpop.permute.xlu0 %948 }
 0x11e   :  { %4482 = vmatmul.mubr.msk.f32.gmra.mrb[28].mxu1 %vm42_vm0, %v623_v23  ;;  %v625_v28 = vmax.f32 %v607_v24, 0.0  ;;  %vm991_vm9 = vcmp.eq.s32.totalorder %v5774_v42, 1 }
 0x11f   :  { %v624_v27 = vmax.f32 %v602_v26, 0.0  ;;  %v5784_v50 = vpop.permute.xlu1 %886 }
 0x121   :  { %4484 = vmatprep.mubr.msk.f32.mxu1 %vm42_vm0, %v624_v27  ;;  %v5778_v44 = vpop.permute.xlu0 %960 }
 0x122   :  { %4485 = vmatmul.mubr.msk.f32.gmra.mrb[30].mxu1 %vm42_vm0, %v625_v28  ;;  %vm995_vm1 = vcmp.eq.s32.totalorder %v5778_v44, 1 }
 0x123   :  { %v5786_v55 = vpop.permute.xlu1 %966 }
 0x125   :  { %v5782_v46 = vpop.permute.xlu0 %972 }
 0x127   :  { %v5794_v60 = vpop.permute.xlu1 %969 }
 0x129   :  { %v863_v52 = vpop.permute.xlu0 %862 }
 0x12a   :  { %vm909_vm3 = vcmp.eq.s32.totalorder %v863_v52, 1 }
 0x12b   :  { %v5802_v1 = vpop.permute.xlu1 %895 }
 0x12d   :  { %v866_v56 = vpop.permute.xlu0 %865 }
 0x12e   :  { %vm910_vm2 = vcmp.eq.s32.totalorder %v866_v56, 1 }
 0x12f   :  { %v5815_v7 = vpop.permute.xlu1 %975 }
 0x131   :  { %v869_v62 = vpop.permute.xlu0 %868 }
 0x132   :  { %vm911_vm7 = vcmp.eq.s32.totalorder %v869_v62, 1 }
 0x133   :  { %v5832_v21 = vpop.permute.xlu1 %898 }
 0x135   :  { %v878_v2 = vpop.permute.xlu0 %877 }
 0x136   :  { %vm914_vm10 = vcmp.eq.s32.totalorder %v878_v2, 1 }
 0x137   :  { %v5847_v38 = vpop.permute.xlu1 %978 }
 0x139   :  { %v5820_v10 = vpop.permute.xlu0 %880 }
 0x13a   :  { %vm915_vm15 = vcmp.eq.s32.totalorder %v5820_v10, 1 }
 0x13d   :  { %v5835_v23 = vpop.permute.xlu0 %889 }
 0x141   :  { %v5852_v52 = vpop.permute.xlu0 %892 }
 0x1b9   :  { %v4401_v47 = vpop.f32.mrb[0].mxu1 }
 0x1ba   :  { %v376_v48 = vpop.f32.mrb[1].mxu1  ;;  %v382_v9 = vadd.f32 %v4401_v47, %v5811_v5 }
 0x1bb   :  { %v377_v12 = vadd.f32 %v5811_v5, %v376_v48 }
 0x1bc   :  { %v926_v16 = vsel %vm910_vm2, %v382_v9, 0.0  ;;  %vm996_vm2 = vcmp.eq.s32.totalorder %v5780_v45, 1  ;;  %v902_v45 = vpop.permute.xlu0 %901 }
 0x1bd   :  { %v4404_v49 = vpop.f32.mrb[2].mxu1  ;;  %v925_v19 = vsel %vm909_vm3, %v377_v12, 0.0  ;;  %vm918_vm3 = vcmp.eq.s32.totalorder %v5835_v23, 1 }
 0x1be   :  { %v386_v51 = vpop.f32.mrb[3].mxu1  ;;  %v392_v17 = vadd.f32 %v4404_v49, %v5811_v5 }
 0x1bf   :  { %v387_v20 = vadd.f32 %v5811_v5, %v386_v51 }
 0x1c0   :  { %v928_v29 = vsel %vm912_vm6, %v392_v17, 0.0  ;;  %vm998_vm6 = vcmp.eq.s32.totalorder %v5794_v60, 1 }
 0x1c1   :  { %v4407_v53 = vpop.f32.mrb[4].mxu1  ;;  %v927_v33 = vsel %vm911_vm7, %v387_v20, 0.0  ;;  %vm920_vm7 = vcmp.eq.s32.totalorder %v5802_v1, 1 }
 0x1c2   :  { %v396_v54 = vpop.f32.mrb[5].mxu1  ;;  %v402_v30 = vadd.f32 %v4407_v53, %v5811_v5 }
 0x1c3   :  { %v397_v34 = vadd.f32 %v5811_v5, %v396_v54 }
 0x1c4   :  { %v930_v49 = vsel %vm914_vm10, %v402_v30, 0.0  ;;  %vm1000_vm10 = vcmp.eq.s32.totalorder %v5815_v7, 1 }
 0x1c5   :  { %v5788_v57 = vpop.f32.mrb[6].mxu1  ;;  %v929_v39 = vsel %vm913_vm11, %v397_v34, 0.0  ;;  %vm922_vm11 = vcmp.eq.s32.totalorder %v902_v45, 1 }
 0x1c6   :  { %v5790_v58 = vpop.f32.mrb[7].mxu1  ;;  %v412_v51 = vadd.f32 %v5788_v57, %v5811_v5 }
 0x1c7   :  { %v407_v41 = vadd.f32 %v5811_v5, %v5790_v58 }
 0x1c8   :  { %v932_v58 = vsel %vm916_vm14, %v412_v51, 0.0 }
 0x1c9   :  { %v5792_v59 = vpop.f32.mrb[8].mxu1  ;;  %v931_v10 = vsel %vm915_vm15, %v407_v41, 0.0 }
 0x1ca   :  { %v5796_v61 = vpop.f32.mrb[9].mxu1  ;;  %v422_v12 = vadd.f32 %v5792_v59, %v5811_v5 }
 0x1cc   :  { %v934_v20 = vsel %vm918_vm3, %v422_v12, 0.0  ;;  %v3782_v12 = vld [vmem:[%s6443_s2 + $0xb0] sm:$0xff] }
 0x1cd   :  { %v5798_v63 = vpop.f32.mrb[10].mxu1 }
 0x1ce   :  { %v5800_v0 = vpop.f32.mrb[11].mxu1 }
 0x1d1   :  { %v5804_v3 = vpop.f32.mrb[12].mxu1 }
 0x1d2   :  { %v5806_v4 = vpop.f32.mrb[13].mxu1 }
 0x1d3   :  { %v437_v7 = vadd.f32 %v5811_v5, %v5806_v4 }
 0x1d5   :  { %v5813_v6 = vpop.f32.mrb[14].mxu1 }
 0x1d6   :  { %v5817_v8 = vpop.f32.mrb[15].mxu1 }
 0x1d7   :  { %v447_v51 = vadd.f32 %v5811_v5, %v5817_v8 }
 0x1d9   :  { %v4465_v13 = vpop.f32.mrb[16].mxu1 }
 0x1da   :  { %v756_v14 = vadd.f32 %v4465_v13, %v5825_v11  ;;  %v750_v15 = vpop.f32.mrb[17].mxu1 }
 0x1db   :  { %v751_v18 = vadd.f32 %v5825_v11, %v750_v15  ;;  %v982_v15 = vpop.permute.xlu1 %981 }
 0x1dc   :  { %v1006_v22 = vsel %vm990_vm4, %v756_v14, %v926_v16  ;;  %v417_v14 = vadd.f32 %v5811_v5, %v5796_v61  ;;  %vm917_vm4 = vcmp.eq.s32.totalorder %v5784_v50, 1  ;;  %v432_v50 = vadd.f32 %v5798_v63, %v5811_v5 }
 0x1dd   :  { %v1005_v24 = vsel %vm989_vm5, %v751_v18, %v925_v19  ;;  %v4468_v25 = vpop.f32.mrb[18].mxu1  ;;  %v1022_v31 = vmax.f32 %v1006_v22, 0.0  ;;  %vm997_vm5 = vcmp.eq.s32.totalorder %v5786_v55, 1  ;;  %v427_v55 = vadd.f32 %v5811_v5, %v5800_v0 }
 0x1de   :  { %v1021_v26 = vmax.f32 %v1005_v24, 0.0  ;;  %v766_v27 = vadd.f32 %v4468_v25, %v5825_v11  ;;  %v760_v28 = vpop.f32.mrb[19].mxu1  ;;  %v933_v24 = vsel %vm917_vm4, %v417_v14, 0.0  ;;  %v442_v0 = vadd.f32 %v5804_v3, %v5811_v5 }
 0x1df   :  { %v761_v32 = vadd.f32 %v5825_v11, %v760_v28  ;;  %v908_v63 = vpop.permute.xlu1 %907  ;;  %v936_v28 = vsel %vm920_vm7, %v432_v50, 0.0  ;;  %vm1002_vm14 = vcmp.eq.s32.totalorder %v982_v15, 1 }
 0x1e0   :  { %v1008_v35 = vsel %vm992_vm8, %v766_v27, %v928_v29  ;;  %4495 = vmatprep.mubr.msk.f32.mxu0 %vm42_vm0, %v1021_v26  ;;  %vm919_vm8 = vcmp.eq.s32.totalorder %v5852_v52, 1  ;;  %v905_v29 = vpop.permute.xlu0 %904  ;;  %v938_v4 = vsel %vm922_vm11, %v442_v0, 0.0  ;;  %vm924_vm15 = vcmp.eq.s32.totalorder %v908_v63, 1 }
 0x1e1   :  { %v1007_v36 = vsel %vm991_vm9, %v761_v32, %v927_v33  ;;  %v4471_v37 = vpop.f32.mrb[20].mxu1  ;;  %4496 = vmatmul.mubr.msk.f32.vlgmr.msra.gmra.mrb[32].mxu0 %vm42_vm0, %v1022_v31  ;;  %v1024_v53 = vmax.f32 %v1008_v35, 0.0  ;;  %vm999_vm9 = vcmp.eq.s32.totalorder %v5782_v46, 1  ;;  %v935_v32 = vsel %vm919_vm8, %v427_v55, 0.0 }
 0x1e2   :  { %v1023_v42 = vmax.f32 %v1007_v36, 0.0  ;;  %v776_v47 = vadd.f32 %v4471_v37, %v5825_v11  ;;  %v770_v48 = vpop.f32.mrb[21].mxu1  ;;  %vm923_vm3 = vcmp.eq.s32.totalorder %v905_v29, 1  ;;  %v5943_v29 = vld [vmem:[%s6446_s1 + $0x8] sm:$0xff] }
 0x1e3   :  { %v771_v54 = vadd.f32 %v5825_v11, %v770_v48  ;;  %v939_v8 = vsel %vm923_vm3, %v447_v51, 0.0 }
 0x1e4   :  { %v1010_v56 = vsel %vm994_vm12, %v776_v47, %v930_v49  ;;  %4498 = vmatprep.mubr.msk.f32.mxu0 %vm42_vm0, %v1023_v42  ;;  %vm921_vm12 = vcmp.eq.s32.totalorder %v5832_v21, 1  ;;  %v988_v42 = vpop.permute.xlu1 %987  ;;  %v452_v47 = vadd.f32 %v5813_v6, %v5811_v5  ;;  %v985_v46 = vpop.permute.xlu0 %984 }
 0x1e5   :  { %v1009_v62 = vsel %vm993_vm13, %v771_v54, %v929_v39  ;;  %v4474_v57 = vpop.f32.mrb[22].mxu1  ;;  %4499 = vmatmul.mubr.msk.f32.gmra.mrb[34].mxu0 %vm42_vm0, %v1024_v53  ;;  %v1026_v13 = vmax.f32 %v1010_v56, 0.0  ;;  %vm1001_vm13 = vcmp.eq.s32.totalorder %v5847_v38, 1  ;;  %v937_v49 = vsel %vm921_vm12, %v437_v7, 0.0  ;;  %v5967_v7 = vld [vmem:[%s6446_s1 + $0x28] sm:$0xff] }
 0x1e6   :  { %v1025_v40 = vmax.f32 %v1009_v62, 0.0  ;;  %v786_v2 = vadd.f32 %v4474_v57, %v5825_v11  ;;  %v780_v9 = vpop.f32.mrb[23].mxu1  ;;  %v940_v56 = vsel %vm924_vm15, %v452_v47, 0.0  ;;  %v6020_v47 = vld [vmem:[%s6446_s1 + $0x70] sm:$0xff] }
 0x1e7   :  { %v781_v43 = vadd.f32 %v5825_v11, %v780_v9  ;;  %v5925_v9 = vld [vmem:[%s6446_s1] sm:$0xff] }
 0x1e8   :  { %v1012_v16 = vsel %vm996_vm2, %v786_v2, %v932_v58  ;;  %4501 = vmatprep.mubr.msk.f32.mxu0 %vm42_vm0, %v1025_v40  ;;  %vm1003_vm2 = vcmp.eq.s32.totalorder %v985_v46, 1  ;;  %4551 = vmatprep.mubr.f32.mxu1 %v5925_v9  ;;  %v3781_v58 = vld [vmem:[%s6443_s2 + $0xa8] sm:$0xff] }
 0x1e9   :  { %v1011_v17 = vsel %vm995_vm1, %v781_v43, %v931_v10  ;;  %v4477_v59 = vpop.f32.mrb[24].mxu1  ;;  %4502 = vmatmul.mubr.msk.f32.gmra.mrb[36].mxu0 %vm42_vm0, %v1026_v13  ;;  %v1028_v22 = vmax.f32 %v1012_v16, 0.0  ;;  %vm1004_vm1 = vcmp.eq.s32.totalorder %v988_v42, 1  ;;  %v3783_v43 = vld [vmem:[%s6443_s2 + $0xb8] sm:$0xff]  ;;  %v6008_v42 = vld [vmem:[%s6446_s1 + $0x60] sm:$0xff] }
 0x1ea   :  { %v1027_v18 = vmax.f32 %v1011_v17, 0.0  ;;  %v796_v61 = vadd.f32 %v4477_v59, %v5825_v11  ;;  %v790_v19 = vpop.f32.mrb[25].mxu1  ;;  %v5155_v10 = vpack.c.bf16 %v3783_v43, %v3782_v12 }
 0x1eb   :  { %v791_v44 = vadd.f32 %v5825_v11, %v790_v19 }
 0x1ec   :  { %v1014_v60 = vsel %vm998_vm6, %v796_v61, %v934_v20  ;;  %4504 = vmatprep.mubr.msk.f32.mxu0 %vm42_vm0, %v1027_v18 }
 0x1ed   :  { %v1013_v25 = vsel %vm997_vm5, %v791_v44, %v933_v24  ;;  %v4480_v23 = vpop.f32.mrb[26].mxu1  ;;  %4505 = vmatmul.mubr.msk.f32.gmra.mrb[38].mxu0 %vm42_vm0, %v1028_v22  ;;  %v1030_v30 = vmax.f32 %v1014_v60, 0.0 }
 0x1ee   :  { %v1029_v26 = vmax.f32 %v1013_v25, 0.0  ;;  %v806_v1 = vadd.f32 %v4480_v23, %v5825_v11  ;;  %v800_v27 = vpop.f32.mrb[27].mxu1 }
 0x1ef   :  { %v801_v31 = vadd.f32 %v5825_v11, %v800_v27 }
 0x1f0   :  { %v1016_v33 = vsel %vm1000_vm10, %v806_v1, %v936_v28  ;;  %4507 = vmatprep.mubr.msk.f32.mxu0 %vm42_vm0, %v1029_v26 }
 0x1f1   :  { %v1015_v34 = vsel %vm999_vm9, %v801_v31, %v935_v32  ;;  %v4483_v3 = vpop.f32.mrb[28].mxu1  ;;  %4508 = vmatmul.mubr.msk.f32.gmra.mrb[40].mxu0 %vm42_vm0, %v1030_v30  ;;  %v1032_v48 = vmax.f32 %v1016_v33, 0.0  ;;  %v5948_v30 = vld [vmem:[%s6446_s1 + $0x10] sm:$0xff]  ;;  %v5955_v31 = vld [vmem:[%s6446_s1 + $0x18] sm:$0xff]  ;;  %v5960_v32 = vld [vmem:[%s6446_s1 + $0x20] sm:$0xff] }
 0x1f2   :  { %v1031_v35 = vmax.f32 %v1015_v34, 0.0  ;;  %v816_v36 = vadd.f32 %v4483_v3, %v5825_v11  ;;  %v810_v37 = vpop.f32.mrb[29].mxu1  ;;  %v5972_v33 = vld [vmem:[%s6446_s1 + $0x30] sm:$0xff]  ;;  %v5979_v34 = vld [vmem:[%s6446_s1 + $0x38] sm:$0xff]  ;;  %v5984_v3 = vld [vmem:[%s6446_s1 + $0x40] sm:$0xff] }
 0x1f3   :  { %v811_v21 = vadd.f32 %v5825_v11, %v810_v37  ;;  %v6003_v37 = vld [vmem:[%s6446_s1 + $0x58] sm:$0xff] }
 0x1f4   :  { %v1018_v52 = vsel %vm1002_vm14, %v816_v36, %v938_v4  ;;  %4510 = vmatprep.mubr.msk.f32.mxu0 %vm42_vm0, %v1031_v35  ;;  %v5991_v35 = vld [vmem:[%s6446_s1 + $0x48] sm:$0xff]  ;;  %v5996_v36 = vld [vmem:[%s6446_s1 + $0x50] sm:$0xff] }
 0x1f5   :  { %v1017_v53 = vsel %vm1001_vm13, %v811_v21, %v937_v49  ;;  %v4486_v54 = vpop.f32.mrb[30].mxu1  ;;  %4511 = vmatmul.mubr.msk.f32.gmra.mrb[42].mxu0 %vm42_vm0, %v1032_v48  ;;  %v1034_v62 = vmax.f32 %v1018_v52, 0.0  ;;  %v6015_v4 = vld [vmem:[%s6446_s1 + $0x68] sm:$0xff]  ;;  %v6027_v48 = vld [vmem:[%s6446_s1 + $0x78] sm:$0xff]  ;;  %v3779_v21 = vld [vmem:[%s6445_s3 + $0x4] ss:$0 sm:$0xff] }
 0x1f6   :  { %v1033_v6 = vmax.f32 %v1017_v53, 0.0  ;;  %v826_v39 = vadd.f32 %v4486_v54, %v5825_v11  ;;  %v820_v41 = vpop.f32.mrb[31].mxu1 }
 0x1f7   :  { %v821_v5 = vadd.f32 %v5825_v11, %v820_v41  ;;  %v3780_v11 = vld [vmem:[%s6443_s2 + $0xa0] sm:$0xff] }
 0x1f8   :  { %v1020_v57 = vsel %vm1004_vm1, %v826_v39, %v940_v56  ;;  %4513 = vmatprep.mubr.msk.f32.mxu0 %vm42_vm0, %v1033_v6  ;;  %v5151_v13 = vpack.c.bf16 %v3781_v58, %v3780_v11 }
 0x1f9   :  { %v1019_v38 = vsel %vm1003_vm2, %v821_v5, %v939_v8  ;;  %4514 = vmatmul.mubr.msk.f32.gmra.mrb[44].mxu0 %vm42_vm0, %v1034_v62  ;;  %v1036_v2 = vmax.f32 %v1020_v57, 0.0 }
 0x1fa   :  { %v1035_v40 = vmax.f32 %v1019_v38, 0.0  ;;  %5152 = vmatprep.subr.bf16.mxu0 %v5151_v13 }
 0x1fb   :  { %5154 = vmatpush3.bf16.msra.mxu0 %v5151_v13 }
 0x1fc   :  { %4516 = vmatprep.mubr.msk.f32.mxu0 %vm42_vm0, %v1035_v40  ;;  %5156 = vmatprep.subr.bf16.mxu0 %v5155_v10 }
 0x1fd   :  { %4517 = vmatmul.mubr.msk.f32.gmra.mrb[46].mxu0 %vm42_vm0, %v1036_v2 }
 0x1ff   :  { %5158 = vmatpush3.bf16.msra.mxu0 %v5155_v10 }
 0x2b4   :  { %v4497_v14 = vpop.f32.mrb[32].mxu0 }
 0x2b5   :  { %v1172_v15 = vpop.f32.mrb[33].mxu0 }
 0x2b6   :  { %v5119_v16 = vpack.c.bf16 %v4497_v14, %v1172_v15 }
 0x2b8   :  { %v4500_v45 = vpop.f32.mrb[34].mxu0  ;;  %5120 = vmatprep.subr.bf16.mxu1 %v5119_v16 }
 0x2b9   :  { %v1182_v17 = vpop.f32.mrb[35].mxu0  ;;  %5122 = vmatpush3.bf16.msra.mxu1 %v5119_v16 }
 0x2ba   :  { %v5123_v59 = vpack.c.bf16 %v4500_v45, %v1182_v17 }
 0x2bc   :  { %v4503_v18 = vpop.f32.mrb[36].mxu0  ;;  %5124 = vmatprep.subr.bf16.mxu1 %v5123_v59 }
 0x2bd   :  { %v1192_v61 = vpop.f32.mrb[37].mxu0  ;;  %5126 = vmatpush3.bf16.msra.mxu1 %v5123_v59 }
 0x2be   :  { %v5127_v19 = vpack.c.bf16 %v4503_v18, %v1192_v61 }
 0x2c0   :  { %v4506_v20 = vpop.f32.mrb[38].mxu0  ;;  %5128 = vmatprep.subr.bf16.mxu1 %v5127_v19 }
 0x2c1   :  { %v1202_v50 = vpop.f32.mrb[39].mxu0  ;;  %5130 = vmatpush3.bf16.msra.mxu1 %v5127_v19 }
 0x2c2   :  { %v5131_v22 = vpack.c.bf16 %v4506_v20, %v1202_v50 }
 0x2c4   :  { %v4509_v44 = vpop.f32.mrb[40].mxu0  ;;  %5132 = vmatprep.subr.bf16.mxu1 %v5131_v22 }
 0x2c5   :  { %v1212_v24 = vpop.f32.mrb[41].mxu0  ;;  %5134 = vmatpush3.bf16.msra.mxu1 %v5131_v22 }
 0x2c6   :  { %v5135_v55 = vpack.c.bf16 %v4509_v44, %v1212_v24 }
 0x2c8   :  { %v4512_v60 = vpop.f32.mrb[42].mxu0  ;;  %5136 = vmatprep.subr.bf16.mxu1 %v5135_v55 }
 0x2c9   :  { %v1222_v25 = vpop.f32.mrb[43].mxu0  ;;  %5138 = vmatpush3.bf16.msra.mxu1 %v5135_v55 }
 0x2ca   :  { %v5139_v23 = vpack.c.bf16 %v4512_v60, %v1222_v25 }
 0x2cc   :  { %v4515_v63 = vpop.f32.mrb[44].mxu0  ;;  %5140 = vmatprep.subr.bf16.mxu1 %v5139_v23 }
 0x2cd   :  { %v1232_v26 = vpop.f32.mrb[45].mxu0  ;;  %5142 = vmatpush3.bf16.msra.mxu1 %v5139_v23 }
 0x2ce   :  { %v5143_v1 = vpack.c.bf16 %v4515_v63, %v1232_v26 }
 0x2d0   :  { %v4518_v27 = vpop.f32.mrb[46].mxu0  ;;  %5144 = vmatprep.subr.bf16.mxu1 %v5143_v1 }
 0x2d1   :  { %v1242_v28 = vpop.f32.mrb[47].mxu0  ;;  %5146 = vmatpush3.bf16.msra.mxu1 %v5143_v1 }
 0x2d2   :  { %v5147_v0 = vpack.c.bf16 %v4518_v27, %v1242_v28 }
 0x2d4   :  { %5148 = vmatprep.subr.bf16.mxu1 %v5147_v0 }
 0x2d5   :  { %5150 = vmatpush3.bf16.msra.mxu1 %v5147_v0 }
 0x2d8   :  { %4552 = vmatmul.mubr.f32.vlgmr.msra.gmra.mrb[32].mxu1 %v5943_v29 }
 0x2d9   :  { %4554 = vmatprep.mubr.f32.mxu1 %v5948_v30 }
 0x2dc   :  { %4555 = vmatmul.mubr.f32.gmra.mrb[34].mxu1 %v5955_v31 }
 0x2dd   :  { %4557 = vmatprep.mubr.f32.mxu1 %v5960_v32 }
 0x2e0   :  { %4558 = vmatmul.mubr.f32.gmra.mrb[36].mxu1 %v5967_v7 }
 0x2e1   :  { %4560 = vmatprep.mubr.f32.mxu1 %v5972_v33 }
 0x2e4   :  { %4561 = vmatmul.mubr.f32.gmra.mrb[38].mxu1 %v5979_v34 }
 0x2e5   :  { %4563 = vmatprep.mubr.f32.mxu1 %v5984_v3 }
 0x2e8   :  { %4564 = vmatmul.mubr.f32.gmra.mrb[40].mxu1 %v5991_v35 }
 0x2e9   :  { %4566 = vmatprep.mubr.f32.mxu1 %v5996_v36 }
 0x2ec   :  { %4567 = vmatmul.mubr.f32.gmra.mrb[42].mxu1 %v6003_v37 }
 0x2ed   :  { %4569 = vmatprep.mubr.f32.mxu1 %v6008_v42 }
 0x2f0   :  { %4570 = vmatmul.mubr.f32.gmra.mrb[44].mxu1 %v6015_v4 }
 0x2f1   :  { %4572 = vmatprep.mubr.f32.mxu1 %v6020_v47 }
 0x2f4   :  { %4573 = vmatmul.mubr.f32.gmra.mrb[46].mxu1 %v6027_v48 }
 0x2f5   :  { %4639 = vmatprep.mubr.f32.mxu1 %v5925_v9 }
 0x3ab   :  { %v4553_v46 = vpop.f32.mrb[32].mxu1 }
 0x3ac   :  { %v1328_v49 = vadd.f32 %v4553_v46, %v3779_v21  ;;  %v1322_v51 = vpop.f32.mrb[33].mxu1 }
 0x3ad   :  { %v1323_v52 = vadd.f32 %v3779_v21, %v1322_v51  ;;  %v3802_v51 = vld [vmem:[%s6443_s2 + $0xc8] sm:$0xff] }
 0x3ae   :  { %v1402_v6 = vmax.f32 %v1328_v49, 0.0  ;;  %v3801_v49 = vld [vmem:[%s6443_s2 + $0xc0] sm:$0xff] }
 0x3af   :  { %v1401_v53 = vmax.f32 %v1323_v52, 0.0  ;;  %v4556_v54 = vpop.f32.mrb[34].mxu1  ;;  %v5191_v52 = vpack.c.bf16 %v3802_v51, %v3801_v49 }
 0x3b0   :  { %v1338_v39 = vadd.f32 %v4556_v54, %v3779_v21  ;;  %v1332_v41 = vpop.f32.mrb[35].mxu1 }
 0x3b1   :  { %v1333_v56 = vadd.f32 %v3779_v21, %v1332_v41  ;;  %4583 = vmatprep.mubr.msk.f32.mxu0 %vm42_vm0, %v1401_v53  ;;  %v3804_v53 = vld [vmem:[%s6443_s2 + $0xd8] sm:$0xff]  ;;  %5192 = vmatprep.subr.bf16.mxu0 %v5191_v52 }
 0x3b2   :  { %4584 = vmatmul.mubr.msk.f32.vlgmr.msra.gmra.mrb[48].mxu0 %vm42_vm0, %v1402_v6  ;;  %v1404_v8 = vmax.f32 %v1338_v39, 0.0 }
 0x3b3   :  { %v1403_v62 = vmax.f32 %v1333_v56, 0.0  ;;  %v4559_v5 = vpop.f32.mrb[36].mxu1  ;;  %5194 = vmatpush3.bf16.msra.mxu0 %v5191_v52 }
 0x3b4   :  { %v1348_v57 = vadd.f32 %v4559_v5, %v3779_v21  ;;  %v1342_v38 = vpop.f32.mrb[37].mxu1 }
 0x3b5   :  { %v1343_v40 = vadd.f32 %v3779_v21, %v1342_v38  ;;  %4586 = vmatprep.mubr.msk.f32.mxu0 %vm42_vm0, %v1403_v62 }
 0x3b6   :  { %4587 = vmatmul.mubr.msk.f32.gmra.mrb[50].mxu0 %vm42_vm0, %v1404_v8  ;;  %v1406_v58 = vmax.f32 %v1348_v57, 0.0 }
 0x3b7   :  { %v1405_v2 = vmax.f32 %v1343_v40, 0.0  ;;  %v4562_v11 = vpop.f32.mrb[38].mxu1 }
 0x3b8   :  { %v1358_v12 = vadd.f32 %v4562_v11, %v3779_v21  ;;  %v1352_v13 = vpop.f32.mrb[39].mxu1 }
 0x3b9   :  { %v1353_v43 = vadd.f32 %v3779_v21, %v1352_v13  ;;  %4589 = vmatprep.mubr.msk.f32.mxu0 %vm42_vm0, %v1405_v2 }
 0x3ba   :  { %4590 = vmatmul.mubr.msk.f32.gmra.mrb[52].mxu0 %vm42_vm0, %v1406_v58  ;;  %v1408_v15 = vmax.f32 %v1358_v12, 0.0 }
 0x3bb   :  { %v1407_v10 = vmax.f32 %v1353_v43, 0.0  ;;  %v4565_v14 = vpop.f32.mrb[40].mxu1 }
 0x3bc   :  { %v1368_v16 = vadd.f32 %v4565_v14, %v3779_v21  ;;  %v1362_v45 = vpop.f32.mrb[41].mxu1 }
 0x3bd   :  { %v1363_v17 = vadd.f32 %v3779_v21, %v1362_v45  ;;  %4592 = vmatprep.mubr.msk.f32.mxu0 %vm42_vm0, %v1407_v10 }
 0x3be   :  { %4593 = vmatmul.mubr.msk.f32.gmra.mrb[54].mxu0 %vm42_vm0, %v1408_v15  ;;  %v1410_v61 = vmax.f32 %v1368_v16, 0.0 }
 0x3bf   :  { %v1409_v59 = vmax.f32 %v1363_v17, 0.0  ;;  %v4568_v18 = vpop.f32.mrb[42].mxu1 }
 0x3c0   :  { %v1378_v19 = vadd.f32 %v4568_v18, %v3779_v21  ;;  %v1372_v20 = vpop.f32.mrb[43].mxu1 }
 0x3c1   :  { %v1373_v50 = vadd.f32 %v3779_v21, %v1372_v20  ;;  %4595 = vmatprep.mubr.msk.f32.mxu0 %vm42_vm0, %v1409_v59 }
 0x3c2   :  { %4596 = vmatmul.mubr.msk.f32.gmra.mrb[56].mxu0 %vm42_vm0, %v1410_v61  ;;  %v1412_v24 = vmax.f32 %v1378_v19, 0.0  ;;  %v3800_v61 = vld [vmem:[%s6445_s3 + $0x5] ss:$0 sm:$0xff] }
 0x3c3   :  { %v1411_v22 = vmax.f32 %v1373_v50, 0.0  ;;  %v4571_v44 = vpop.f32.mrb[44].mxu1 }
 0x3c4   :  { %v1388_v55 = vadd.f32 %v4571_v44, %v3779_v21  ;;  %v1382_v60 = vpop.f32.mrb[45].mxu1 }
 0x3c5   :  { %v1383_v25 = vadd.f32 %v3779_v21, %v1382_v60  ;;  %4598 = vmatprep.mubr.msk.f32.mxu0 %vm42_vm0, %v1411_v22 }
 0x3c6   :  { %4599 = vmatmul.mubr.msk.f32.gmra.mrb[58].mxu0 %vm42_vm0, %v1412_v24  ;;  %v1414_v26 = vmax.f32 %v1388_v55, 0.0 }
 0x3c7   :  { %v1413_v23 = vmax.f32 %v1383_v25, 0.0  ;;  %v4574_v63 = vpop.f32.mrb[46].mxu1 }
 0x3c8   :  { %v1398_v1 = vadd.f32 %v4574_v63, %v3779_v21  ;;  %v1392_v27 = vpop.f32.mrb[47].mxu1 }
 0x3c9   :  { %v1393_v28 = vadd.f32 %v3779_v21, %v1392_v27  ;;  %4601 = vmatprep.mubr.msk.f32.mxu0 %vm42_vm0, %v1413_v23  ;;  %v3803_v21 = vld [vmem:[%s6443_s2 + $0xd0] sm:$0xff] }
 0x3ca   :  { %4602 = vmatmul.mubr.msk.f32.gmra.mrb[60].mxu0 %vm42_vm0, %v1414_v26  ;;  %v1416_v46 = vmax.f32 %v1398_v1, 0.0  ;;  %v5195_v54 = vpack.c.bf16 %v3804_v53, %v3803_v21 }
 0x3cb   :  { %v1415_v0 = vmax.f32 %v1393_v28, 0.0 }
 0x3cc   :  { %5196 = vmatprep.subr.bf16.mxu0 %v5195_v54 }
 0x3cd   :  { %4604 = vmatprep.mubr.msk.f32.mxu0 %vm42_vm0, %v1415_v0  ;;  %5198 = vmatpush3.bf16.msra.mxu0 %v5195_v54 }
 0x3ce   :  { %4605 = vmatmul.mubr.msk.f32.gmra.mrb[62].mxu0 %vm42_vm0, %v1416_v46 }
 0x485   :  { %v4585_v6 = vpop.f32.mrb[48].mxu0 }
 0x486   :  { %v1536_v39 = vpop.f32.mrb[49].mxu0 }
 0x487   :  { %v5159_v41 = vpack.c.bf16 %v4585_v6, %v1536_v39 }
 0x489   :  { %v4588_v56 = vpop.f32.mrb[50].mxu0  ;;  %5160 = vmatprep.subr.bf16.mxu1 %v5159_v41 }
 0x48a   :  { %v1546_v62 = vpop.f32.mrb[51].mxu0  ;;  %5162 = vmatpush3.bf16.msra.mxu1 %v5159_v41 }
 0x48b   :  { %v5163_v5 = vpack.c.bf16 %v4588_v56, %v1546_v62 }
 0x48d   :  { %v4591_v8 = vpop.f32.mrb[52].mxu0  ;;  %5164 = vmatprep.subr.bf16.mxu1 %v5163_v5 }
 0x48e   :  { %v1556_v57 = vpop.f32.mrb[53].mxu0  ;;  %5166 = vmatpush3.bf16.msra.mxu1 %v5163_v5 }
 0x48f   :  { %v5167_v38 = vpack.c.bf16 %v4591_v8, %v1556_v57 }
 0x491   :  { %v4594_v40 = vpop.f32.mrb[54].mxu0  ;;  %5168 = vmatprep.subr.bf16.mxu1 %v5167_v38 }
 0x492   :  { %v1566_v2 = vpop.f32.mrb[55].mxu0  ;;  %5170 = vmatpush3.bf16.msra.mxu1 %v5167_v38 }
 0x493   :  { %v5171_v11 = vpack.c.bf16 %v4594_v40, %v1566_v2 }
 0x495   :  { %v4597_v58 = vpop.f32.mrb[56].mxu0  ;;  %5172 = vmatprep.subr.bf16.mxu1 %v5171_v11 }
 0x496   :  { %v1576_v12 = vpop.f32.mrb[57].mxu0  ;;  %5174 = vmatpush3.bf16.msra.mxu1 %v5171_v11 }
 0x497   :  { %v5175_v13 = vpack.c.bf16 %v4597_v58, %v1576_v12 }
 0x499   :  { %v4600_v43 = vpop.f32.mrb[58].mxu0  ;;  %5176 = vmatprep.subr.bf16.mxu1 %v5175_v13 }
 0x49a   :  { %v1586_v10 = vpop.f32.mrb[59].mxu0  ;;  %5178 = vmatpush3.bf16.msra.mxu1 %v5175_v13 }
 0x49b   :  { %v5179_v14 = vpack.c.bf16 %v4600_v43, %v1586_v10 }
 0x49d   :  { %v4603_v15 = vpop.f32.mrb[60].mxu0  ;;  %5180 = vmatprep.subr.bf16.mxu1 %v5179_v14 }
 0x49e   :  { %v1596_v16 = vpop.f32.mrb[61].mxu0  ;;  %5182 = vmatpush3.bf16.msra.mxu1 %v5179_v14 }
 0x49f   :  { %v5183_v45 = vpack.c.bf16 %v4603_v15, %v1596_v16 }
 0x4a1   :  { %v4606_v17 = vpop.f32.mrb[62].mxu0  ;;  %5184 = vmatprep.subr.bf16.mxu1 %v5183_v45 }
 0x4a2   :  { %v1606_v59 = vpop.f32.mrb[63].mxu0  ;;  %5186 = vmatpush3.bf16.msra.mxu1 %v5183_v45 }
 0x4a3   :  { %v5187_v18 = vpack.c.bf16 %v4606_v17, %v1606_v59 }
 0x4a5   :  { %5188 = vmatprep.subr.bf16.mxu1 %v5187_v18 }
 0x4a6   :  { %5190 = vmatpush3.bf16.msra.mxu1 %v5187_v18 }
 0x4a9   :  { %4640 = vmatmul.mubr.f32.vlgmr.msra.gmra.mrb[48].mxu1 %v5943_v29 }
 0x4aa   :  { %4642 = vmatprep.mubr.f32.mxu1 %v5948_v30 }
 0x4ad   :  { %4643 = vmatmul.mubr.f32.gmra.mrb[50].mxu1 %v5955_v31 }
 0x4ae   :  { %4645 = vmatprep.mubr.f32.mxu1 %v5960_v32 }
 0x4b1   :  { %4646 = vmatmul.mubr.f32.gmra.mrb[52].mxu1 %v5967_v7 }
 0x4b2   :  { %4648 = vmatprep.mubr.f32.mxu1 %v5972_v33 }
 0x4b5   :  { %4649 = vmatmul.mubr.f32.gmra.mrb[54].mxu1 %v5979_v34 }
 0x4b6   :  { %4651 = vmatprep.mubr.f32.mxu1 %v5984_v3 }
 0x4b9   :  { %4652 = vmatmul.mubr.f32.gmra.mrb[56].mxu1 %v5991_v35 }
 0x4ba   :  { %4654 = vmatprep.mubr.f32.mxu1 %v5996_v36 }
 0x4bd   :  { %4655 = vmatmul.mubr.f32.gmra.mrb[58].mxu1 %v6003_v37 }
 0x4be   :  { %4657 = vmatprep.mubr.f32.mxu1 %v6008_v42 }
 0x4c1   :  { %4658 = vmatmul.mubr.f32.gmra.mrb[60].mxu1 %v6015_v4 }
 0x4c2   :  { %4660 = vmatprep.mubr.f32.mxu1 %v6020_v47 }
 0x4c5   :  { %4661 = vmatmul.mubr.f32.gmra.mrb[62].mxu1 %v6027_v48 }
 0x4c6   :  { %4727 = vmatprep.mubr.f32.mxu1 %v5925_v9 }
 0x57c   :  { %v4641_v19 = vpop.f32.mrb[48].mxu1 }
 0x57d   :  { %v1692_v20 = vadd.f32 %v4641_v19, %v3800_v61  ;;  %v1686_v50 = vpop.f32.mrb[49].mxu1 }
 0x57e   :  { %v1687_v22 = vadd.f32 %v3800_v61, %v1686_v50  ;;  %v3823_v50 = vld [vmem:[%s6443_s2 + $0xe8] sm:$0xff] }
 0x57f   :  { %v1766_v55 = vmax.f32 %v1692_v20, 0.0  ;;  %v3822_v20 = vld [vmem:[%s6443_s2 + $0xe0] sm:$0xff] }
 0x580   :  { %v1765_v44 = vmax.f32 %v1687_v22, 0.0  ;;  %v4644_v24 = vpop.f32.mrb[50].mxu1  ;;  %v5231_v22 = vpack.c.bf16 %v3823_v50, %v3822_v20 }
 0x581   :  { %v1702_v60 = vadd.f32 %v4644_v24, %v3800_v61  ;;  %v1696_v25 = vpop.f32.mrb[51].mxu1 }
 0x582   :  { %v1697_v23 = vadd.f32 %v3800_v61, %v1696_v25  ;;  %4671 = vmatprep.mubr.msk.f32.mxu0 %vm42_vm0, %v1765_v44  ;;  %v3825_v44 = vld [vmem:[%s6443_s2 + $0xf8] sm:$0xff]  ;;  %5232 = vmatprep.subr.bf16.mxu0 %v5231_v22 }
 0x583   :  { %4672 = vmatmul.mubr.msk.f32.vlgmr.msra.gmra.mrb[64].mxu0 %vm42_vm0, %v1766_v55  ;;  %v1768_v1 = vmax.f32 %v1702_v60, 0.0 }
 0x584   :  { %v1767_v63 = vmax.f32 %v1697_v23, 0.0  ;;  %v4647_v26 = vpop.f32.mrb[52].mxu1  ;;  %5234 = vmatpush3.bf16.msra.mxu0 %v5231_v22 }
 0x585   :  { %v1712_v27 = vadd.f32 %v4647_v26, %v3800_v61  ;;  %v1706_v28 = vpop.f32.mrb[53].mxu1 }
 0x586   :  { %v1707_v0 = vadd.f32 %v3800_v61, %v1706_v28  ;;  %4674 = vmatprep.mubr.msk.f32.mxu0 %vm42_vm0, %v1767_v63 }
 0x587   :  { %4675 = vmatmul.mubr.msk.f32.gmra.mrb[66].mxu0 %vm42_vm0, %v1768_v1  ;;  %v1770_v51 = vmax.f32 %v1712_v27, 0.0 }
 0x588   :  { %v1769_v46 = vmax.f32 %v1707_v0, 0.0  ;;  %v4650_v49 = vpop.f32.mrb[54].mxu1 }
 0x589   :  { %v1722_v21 = vadd.f32 %v4650_v49, %v3800_v61  ;;  %v1716_v52 = vpop.f32.mrb[55].mxu1 }
 0x58a   :  { %v1717_v53 = vadd.f32 %v3800_v61, %v1716_v52  ;;  %4677 = vmatprep.mubr.msk.f32.mxu0 %vm42_vm0, %v1769_v46 }
 0x58b   :  { %4678 = vmatmul.mubr.msk.f32.gmra.mrb[68].mxu0 %vm42_vm0, %v1770_v51  ;;  %v1772_v39 = vmax.f32 %v1722_v21, 0.0 }
 0x58c   :  { %v1771_v54 = vmax.f32 %v1717_v53, 0.0  ;;  %v4653_v6 = vpop.f32.mrb[56].mxu1 }
 0x58d   :  { %v1732_v41 = vadd.f32 %v4653_v6, %v3800_v61  ;;  %v1726_v56 = vpop.f32.mrb[57].mxu1 }
 0x58e   :  { %v1727_v62 = vadd.f32 %v3800_v61, %v1726_v56  ;;  %4680 = vmatprep.mubr.msk.f32.mxu0 %vm42_vm0, %v1771_v54 }
 0x58f   :  { %4681 = vmatmul.mubr.msk.f32.gmra.mrb[70].mxu0 %vm42_vm0, %v1772_v39  ;;  %v1774_v57 = vmax.f32 %v1732_v41, 0.0 }
 0x590   :  { %v1773_v5 = vmax.f32 %v1727_v62, 0.0  ;;  %v4656_v8 = vpop.f32.mrb[58].mxu1 }
 0x591   :  { %v1742_v38 = vadd.f32 %v4656_v8, %v3800_v61  ;;  %v1736_v40 = vpop.f32.mrb[59].mxu1 }
 0x592   :  { %v1737_v2 = vadd.f32 %v3800_v61, %v1736_v40  ;;  %4683 = vmatprep.mubr.msk.f32.mxu0 %vm42_vm0, %v1773_v5 }
 0x593   :  { %4684 = vmatmul.mubr.msk.f32.gmra.mrb[72].mxu0 %vm42_vm0, %v1774_v57  ;;  %v1776_v12 = vmax.f32 %v1742_v38, 0.0  ;;  %v3821_v57 = vld [vmem:[%s6445_s3 + $0x6] ss:$0 sm:$0xff] }
 0x594   :  { %v1775_v11 = vmax.f32 %v1737_v2, 0.0  ;;  %v4659_v58 = vpop.f32.mrb[60].mxu1 }
 0x595   :  { %v1752_v13 = vadd.f32 %v4659_v58, %v3800_v61  ;;  %v1746_v43 = vpop.f32.mrb[61].mxu1 }
 0x596   :  { %v1747_v10 = vadd.f32 %v3800_v61, %v1746_v43  ;;  %4686 = vmatprep.mubr.msk.f32.mxu0 %vm42_vm0, %v1775_v11 }
 0x597   :  { %4687 = vmatmul.mubr.msk.f32.gmra.mrb[74].mxu0 %vm42_vm0, %v1776_v12  ;;  %v1778_v16 = vmax.f32 %v1752_v13, 0.0 }
 0x598   :  { %v1777_v14 = vmax.f32 %v1747_v10, 0.0  ;;  %v4662_v15 = vpop.f32.mrb[62].mxu1 }
 0x599   :  { %v1762_v45 = vadd.f32 %v4662_v15, %v3800_v61  ;;  %v1756_v17 = vpop.f32.mrb[63].mxu1 }
 0x59a   :  { %v1757_v59 = vadd.f32 %v3800_v61, %v1756_v17  ;;  %4689 = vmatprep.mubr.msk.f32.mxu0 %vm42_vm0, %v1777_v14  ;;  %v3824_v61 = vld [vmem:[%s6443_s2 + $0xf0] sm:$0xff] }
 0x59b   :  { %4690 = vmatmul.mubr.msk.f32.gmra.mrb[76].mxu0 %vm42_vm0, %v1778_v16  ;;  %v1780_v19 = vmax.f32 %v1762_v45, 0.0  ;;  %v5235_v24 = vpack.c.bf16 %v3825_v44, %v3824_v61 }
 0x59c   :  { %v1779_v18 = vmax.f32 %v1757_v59, 0.0 }
 0x59d   :  { %5236 = vmatprep.subr.bf16.mxu0 %v5235_v24 }
 0x59e   :  { %4692 = vmatprep.mubr.msk.f32.mxu0 %vm42_vm0, %v1779_v18  ;;  %5238 = vmatpush3.bf16.msra.mxu0 %v5235_v24 }
 0x59f   :  { %4693 = vmatmul.mubr.msk.f32.gmra.mrb[78].mxu0 %vm42_vm0, %v1780_v19 }
 0x656   :  { %v4673_v55 = vpop.f32.mrb[64].mxu0 }
 0x657   :  { %v1900_v60 = vpop.f32.mrb[65].mxu0 }
 0x658   :  { %v5199_v25 = vpack.c.bf16 %v4673_v55, %v1900_v60 }
 0x65a   :  { %v4676_v23 = vpop.f32.mrb[66].mxu0  ;;  %5200 = vmatprep.subr.bf16.mxu1 %v5199_v25 }
 0x65b   :  { %v1910_v63 = vpop.f32.mrb[67].mxu0  ;;  %5202 = vmatpush3.bf16.msra.mxu1 %v5199_v25 }
 0x65c   :  { %v5203_v26 = vpack.c.bf16 %v4676_v23, %v1910_v63 }
 0x65e   :  { %v4679_v1 = vpop.f32.mrb[68].mxu0  ;;  %5204 = vmatprep.subr.bf16.mxu1 %v5203_v26 }
 0x65f   :  { %v1920_v27 = vpop.f32.mrb[69].mxu0  ;;  %5206 = vmatpush3.bf16.msra.mxu1 %v5203_v26 }
 0x660   :  { %v5207_v28 = vpack.c.bf16 %v4679_v1, %v1920_v27 }
 0x662   :  { %v4682_v0 = vpop.f32.mrb[70].mxu0  ;;  %5208 = vmatprep.subr.bf16.mxu1 %v5207_v28 }
 0x663   :  { %v1930_v46 = vpop.f32.mrb[71].mxu0  ;;  %5210 = vmatpush3.bf16.msra.mxu1 %v5207_v28 }
 0x664   :  { %v5211_v49 = vpack.c.bf16 %v4682_v0, %v1930_v46 }
 0x666   :  { %v4685_v51 = vpop.f32.mrb[72].mxu0  ;;  %5212 = vmatprep.subr.bf16.mxu1 %v5211_v49 }
 0x667   :  { %v1940_v21 = vpop.f32.mrb[73].mxu0  ;;  %5214 = vmatpush3.bf16.msra.mxu1 %v5211_v49 }
 0x668   :  { %v5215_v52 = vpack.c.bf16 %v4685_v51, %v1940_v21 }
 0x66a   :  { %v4688_v53 = vpop.f32.mrb[74].mxu0  ;;  %5216 = vmatprep.subr.bf16.mxu1 %v5215_v52 }
 0x66b   :  { %v1950_v54 = vpop.f32.mrb[75].mxu0  ;;  %5218 = vmatpush3.bf16.msra.mxu1 %v5215_v52 }
 0x66c   :  { %v5219_v6 = vpack.c.bf16 %v4688_v53, %v1950_v54 }
 0x66e   :  { %v4691_v39 = vpop.f32.mrb[76].mxu0  ;;  %5220 = vmatprep.subr.bf16.mxu1 %v5219_v6 }
 0x66f   :  { %v1960_v41 = vpop.f32.mrb[77].mxu0  ;;  %5222 = vmatpush3.bf16.msra.mxu1 %v5219_v6 }
 0x670   :  { %v5223_v56 = vpack.c.bf16 %v4691_v39, %v1960_v41 }
 0x672   :  { %v4694_v62 = vpop.f32.mrb[78].mxu0  ;;  %5224 = vmatprep.subr.bf16.mxu1 %v5223_v56 }
 0x673   :  { %v1970_v5 = vpop.f32.mrb[79].mxu0  ;;  %5226 = vmatpush3.bf16.msra.mxu1 %v5223_v56 }
 0x674   :  { %v5227_v8 = vpack.c.bf16 %v4694_v62, %v1970_v5 }
 0x676   :  { %5228 = vmatprep.subr.bf16.mxu1 %v5227_v8 }
 0x677   :  { %5230 = vmatpush3.bf16.msra.mxu1 %v5227_v8 }
 0x67a   :  { %4728 = vmatmul.mubr.f32.vlgmr.msra.gmra.mrb[64].mxu1 %v5943_v29 }
 0x67b   :  { %4730 = vmatprep.mubr.f32.mxu1 %v5948_v30 }
 0x67e   :  { %4731 = vmatmul.mubr.f32.gmra.mrb[66].mxu1 %v5955_v31 }
 0x67f   :  { %4733 = vmatprep.mubr.f32.mxu1 %v5960_v32 }
 0x682   :  { %4734 = vmatmul.mubr.f32.gmra.mrb[68].mxu1 %v5967_v7 }
 0x683   :  { %4736 = vmatprep.mubr.f32.mxu1 %v5972_v33 }
 0x686   :  { %4737 = vmatmul.mubr.f32.gmra.mrb[70].mxu1 %v5979_v34 }
 0x687   :  { %4739 = vmatprep.mubr.f32.mxu1 %v5984_v3 }
 0x68a   :  { %4740 = vmatmul.mubr.f32.gmra.mrb[72].mxu1 %v5991_v35 }
 0x68b   :  { %4742 = vmatprep.mubr.f32.mxu1 %v5996_v36 }
 0x68e   :  { %4743 = vmatmul.mubr.f32.gmra.mrb[74].mxu1 %v6003_v37 }
 0x68f   :  { %4745 = vmatprep.mubr.f32.mxu1 %v6008_v42 }
 0x692   :  { %4746 = vmatmul.mubr.f32.gmra.mrb[76].mxu1 %v6015_v4 }
 0x693   :  { %4748 = vmatprep.mubr.f32.mxu1 %v6020_v47 }
 0x696   :  { %4749 = vmatmul.mubr.f32.gmra.mrb[78].mxu1 %v6027_v48 }
 0x697   :  { %4815 = vmatprep.mubr.f32.mxu1 %v5925_v9 }
 0x74d   :  { %v4729_v38 = vpop.f32.mrb[64].mxu1 }
 0x74e   :  { %v2056_v40 = vadd.f32 %v4729_v38, %v3821_v57  ;;  %v2050_v2 = vpop.f32.mrb[65].mxu1 }
 0x74f   :  { %v2051_v11 = vadd.f32 %v3821_v57, %v2050_v2  ;;  %v3844_v2 = vld [vmem:[%s6443_s2 + $0x108] sm:$0xff] }
 0x750   :  { %v2130_v13 = vmax.f32 %v2056_v40, 0.0  ;;  %v3843_v40 = vld [vmem:[%s6443_s2 + $0x100] sm:$0xff] }
 0x751   :  { %v2129_v58 = vmax.f32 %v2051_v11, 0.0  ;;  %v4732_v12 = vpop.f32.mrb[66].mxu1  ;;  %v5271_v11 = vpack.c.bf16 %v3844_v2, %v3843_v40 }
 0x752   :  { %v2066_v43 = vadd.f32 %v4732_v12, %v3821_v57  ;;  %v2060_v10 = vpop.f32.mrb[67].mxu1 }
 0x753   :  { %v2061_v14 = vadd.f32 %v3821_v57, %v2060_v10  ;;  %4759 = vmatprep.mubr.msk.f32.mxu0 %vm42_vm0, %v2129_v58  ;;  %v3846_v58 = vld [vmem:[%s6443_s2 + $0x118] sm:$0xff]  ;;  %5272 = vmatprep.subr.bf16.mxu0 %v5271_v11 }
 0x754   :  { %4760 = vmatmul.mubr.msk.f32.vlgmr.msra.gmra.mrb[80].mxu0 %vm42_vm0, %v2130_v13  ;;  %v2132_v45 = vmax.f32 %v2066_v43, 0.0 }
 0x755   :  { %v2131_v15 = vmax.f32 %v2061_v14, 0.0  ;;  %v4735_v16 = vpop.f32.mrb[68].mxu1  ;;  %5274 = vmatpush3.bf16.msra.mxu0 %v5271_v11 }
 0x756   :  { %v2076_v17 = vadd.f32 %v4735_v16, %v3821_v57  ;;  %v2070_v59 = vpop.f32.mrb[69].mxu1 }
 0x757   :  { %v2071_v18 = vadd.f32 %v3821_v57, %v2070_v59  ;;  %4762 = vmatprep.mubr.msk.f32.mxu0 %vm42_vm0, %v2131_v15 }
 0x758   :  { %4763 = vmatmul.mubr.msk.f32.gmra.mrb[82].mxu0 %vm42_vm0, %v2132_v45  ;;  %v2134_v50 = vmax.f32 %v2076_v17, 0.0 }
 0x759   :  { %v2133_v19 = vmax.f32 %v2071_v18, 0.0  ;;  %v4738_v20 = vpop.f32.mrb[70].mxu1 }
 0x75a   :  { %v2086_v61 = vadd.f32 %v4738_v20, %v3821_v57  ;;  %v2080_v22 = vpop.f32.mrb[71].mxu1 }
 0x75b   :  { %v2081_v44 = vadd.f32 %v3821_v57, %v2080_v22  ;;  %4765 = vmatprep.mubr.msk.f32.mxu0 %vm42_vm0, %v2133_v19 }
 0x75c   :  { %4766 = vmatmul.mubr.msk.f32.gmra.mrb[84].mxu0 %vm42_vm0, %v2134_v50  ;;  %v2136_v60 = vmax.f32 %v2086_v61, 0.0 }
 0x75d   :  { %v2135_v24 = vmax.f32 %v2081_v44, 0.0  ;;  %v4741_v55 = vpop.f32.mrb[72].mxu1 }
 0x75e   :  { %v2096_v25 = vadd.f32 %v4741_v55, %v3821_v57  ;;  %v2090_v23 = vpop.f32.mrb[73].mxu1 }
 0x75f   :  { %v2091_v63 = vadd.f32 %v3821_v57, %v2090_v23  ;;  %4768 = vmatprep.mubr.msk.f32.mxu0 %vm42_vm0, %v2135_v24 }
 0x760   :  { %4769 = vmatmul.mubr.msk.f32.gmra.mrb[86].mxu0 %vm42_vm0, %v2136_v60  ;;  %v2138_v27 = vmax.f32 %v2096_v25, 0.0 }
 0x761   :  { %v2137_v26 = vmax.f32 %v2091_v63, 0.0  ;;  %v4744_v1 = vpop.f32.mrb[74].mxu1 }
 0x762   :  { %v2106_v28 = vadd.f32 %v4744_v1, %v3821_v57  ;;  %v2100_v0 = vpop.f32.mrb[75].mxu1 }
 0x763   :  { %v2101_v46 = vadd.f32 %v3821_v57, %v2100_v0  ;;  %4771 = vmatprep.mubr.msk.f32.mxu0 %vm42_vm0, %v2137_v26 }
 0x764   :  { %4772 = vmatmul.mubr.msk.f32.gmra.mrb[88].mxu0 %vm42_vm0, %v2138_v27  ;;  %v2140_v21 = vmax.f32 %v2106_v28, 0.0 }
 0x765   :  { %v2139_v49 = vmax.f32 %v2101_v46, 0.0  ;;  %v4747_v51 = vpop.f32.mrb[76].mxu1 }
 0x766   :  { %v2116_v52 = vadd.f32 %v4747_v51, %v3821_v57  ;;  %v2110_v53 = vpop.f32.mrb[77].mxu1 }
 0x767   :  { %v2111_v54 = vadd.f32 %v3821_v57, %v2110_v53  ;;  %4774 = vmatprep.mubr.msk.f32.mxu0 %vm42_vm0, %v2139_v49 }
 0x768   :  { %4775 = vmatmul.mubr.msk.f32.gmra.mrb[90].mxu0 %vm42_vm0, %v2140_v21  ;;  %v2142_v41 = vmax.f32 %v2116_v52, 0.0 }
 0x769   :  { %v2141_v6 = vmax.f32 %v2111_v54, 0.0  ;;  %v4750_v39 = vpop.f32.mrb[78].mxu1 }
 0x76a   :  { %v2126_v56 = vadd.f32 %v4750_v39, %v3821_v57  ;;  %v2120_v62 = vpop.f32.mrb[79].mxu1 }
 0x76b   :  { %v2121_v5 = vadd.f32 %v3821_v57, %v2120_v62  ;;  %4777 = vmatprep.mubr.msk.f32.mxu0 %vm42_vm0, %v2141_v6  ;;  %v3845_v57 = vld [vmem:[%s6443_s2 + $0x110] sm:$0xff] }
 0x76c   :  { %4778 = vmatmul.mubr.msk.f32.gmra.mrb[92].mxu0 %vm42_vm0, %v2142_v41  ;;  %v2144_v38 = vmax.f32 %v2126_v56, 0.0  ;;  %v5275_v12 = vpack.c.bf16 %v3846_v58, %v3845_v57 }
 0x76d   :  { %v2143_v8 = vmax.f32 %v2121_v5, 0.0 }
 0x76e   :  { %5276 = vmatprep.subr.bf16.mxu0 %v5275_v12 }
 0x76f   :  { %4780 = vmatprep.mubr.msk.f32.mxu0 %vm42_vm0, %v2143_v8  ;;  %5278 = vmatpush3.bf16.msra.mxu0 %v5275_v12 }
 0x770   :  { %4781 = vmatmul.mubr.msk.f32.gmra.mrb[94].mxu0 %vm42_vm0, %v2144_v38 }
 0x827   :  { %v4761_v13 = vpop.f32.mrb[80].mxu0 }
 0x828   :  { %v2264_v43 = vpop.f32.mrb[81].mxu0 }
 0x829   :  { %v5239_v10 = vpack.c.bf16 %v4761_v13, %v2264_v43 }
 0x82b   :  { %v4764_v14 = vpop.f32.mrb[82].mxu0  ;;  %5240 = vmatprep.subr.bf16.mxu1 %v5239_v10 }
 0x82c   :  { %v2274_v15 = vpop.f32.mrb[83].mxu0  ;;  %5242 = vmatpush3.bf16.msra.mxu1 %v5239_v10 }
 0x82d   :  { %v5243_v16 = vpack.c.bf16 %v4764_v14, %v2274_v15 }
 0x82f   :  { %v4767_v45 = vpop.f32.mrb[84].mxu0  ;;  %5244 = vmatprep.subr.bf16.mxu1 %v5243_v16 }
 0x830   :  { %v2284_v17 = vpop.f32.mrb[85].mxu0  ;;  %5246 = vmatpush3.bf16.msra.mxu1 %v5243_v16 }
 0x831   :  { %v5247_v59 = vpack.c.bf16 %v4767_v45, %v2284_v17 }
 0x833   :  { %v4770_v18 = vpop.f32.mrb[86].mxu0  ;;  %5248 = vmatprep.subr.bf16.mxu1 %v5247_v59 }
 0x834   :  { %v2294_v19 = vpop.f32.mrb[87].mxu0  ;;  %5250 = vmatpush3.bf16.msra.mxu1 %v5247_v59 }
 0x835   :  { %v5251_v20 = vpack.c.bf16 %v4770_v18, %v2294_v19  ;;  %v3864_v18 = vld [vmem:[%s6443_s2 + $0x120] sm:$0xff]  ;;  %v3865_v19 = vld [vmem:[%s6443_s2 + $0x128] sm:$0xff] }
 0x837   :  { %v4773_v50 = vpop.f32.mrb[88].mxu0  ;;  %5252 = vmatprep.subr.bf16.mxu1 %v5251_v20 }
 0x838   :  { %v2304_v61 = vpop.f32.mrb[89].mxu0  ;;  %5254 = vmatpush3.bf16.msra.mxu1 %v5251_v20  ;;  %v3866_v20 = vld [vmem:[%s6443_s2 + $0x130] sm:$0xff] }
 0x839   :  { %v5255_v22 = vpack.c.bf16 %v4773_v50, %v2304_v61  ;;  %v5311_v50 = vpack.c.bf16 %v3865_v19, %v3864_v18  ;;  %v3867_v61 = vld [vmem:[%s6443_s2 + $0x138] sm:$0xff] }
 0x83b   :  { %v4776_v44 = vpop.f32.mrb[90].mxu0  ;;  %5256 = vmatprep.subr.bf16.mxu1 %v5255_v22  ;;  %5312 = vmatprep.subr.bf16.mxu0 %v5311_v50 }
 0x83c   :  { %v2314_v24 = vpop.f32.mrb[91].mxu0  ;;  %5258 = vmatpush3.bf16.msra.mxu1 %v5255_v22  ;;  %v5315_v22 = vpack.c.bf16 %v3867_v61, %v3866_v20 }
 0x83d   :  { %v5259_v55 = vpack.c.bf16 %v4776_v44, %v2314_v24 }
 0x83f   :  { %v4779_v60 = vpop.f32.mrb[92].mxu0  ;;  %5260 = vmatprep.subr.bf16.mxu1 %v5259_v55 }
 0x840   :  { %v2324_v25 = vpop.f32.mrb[93].mxu0  ;;  %5262 = vmatpush3.bf16.msra.mxu1 %v5259_v55 }
 0x841   :  { %v5263_v23 = vpack.c.bf16 %v4779_v60, %v2324_v25 }
 0x843   :  { %v4782_v63 = vpop.f32.mrb[94].mxu0  ;;  %5264 = vmatprep.subr.bf16.mxu1 %v5263_v23 }
 0x844   :  { %v2334_v26 = vpop.f32.mrb[95].mxu0  ;;  %5266 = vmatpush3.bf16.msra.mxu1 %v5263_v23 }
 0x845   :  { %v5267_v1 = vpack.c.bf16 %v4782_v63, %v2334_v26 }
 0x847   :  { %5268 = vmatprep.subr.bf16.mxu1 %v5267_v1 }
 0x848   :  { %5270 = vmatpush3.bf16.msra.mxu1 %v5267_v1 }
 0x84b   :  { %4816 = vmatmul.mubr.f32.vlgmr.msra.gmra.mrb[80].mxu1 %v5943_v29  ;;  %v3842_v29 = vld [vmem:[%s6445_s3 + $0x7] ss:$0 sm:$0xff] }
 0x84c   :  { %4818 = vmatprep.mubr.f32.mxu1 %v5948_v30 }
 0x84f   :  { %4819 = vmatmul.mubr.f32.gmra.mrb[82].mxu1 %v5955_v31 }
 0x850   :  { %4821 = vmatprep.mubr.f32.mxu1 %v5960_v32 }
 0x853   :  { %4822 = vmatmul.mubr.f32.gmra.mrb[84].mxu1 %v5967_v7 }
 0x854   :  { %4824 = vmatprep.mubr.f32.mxu1 %v5972_v33 }
 0x857   :  { %4825 = vmatmul.mubr.f32.gmra.mrb[86].mxu1 %v5979_v34 }
 0x858   :  { %4827 = vmatprep.mubr.f32.mxu1 %v5984_v3 }
 0x85b   :  { %4828 = vmatmul.mubr.f32.gmra.mrb[88].mxu1 %v5991_v35 }
 0x85c   :  { %4830 = vmatprep.mubr.f32.mxu1 %v5996_v36 }
 0x85f   :  { %4831 = vmatmul.mubr.f32.gmra.mrb[90].mxu1 %v6003_v37 }
 0x860   :  { %4833 = vmatprep.mubr.f32.mxu1 %v6008_v42 }
 0x863   :  { %4834 = vmatmul.mubr.f32.gmra.mrb[92].mxu1 %v6015_v4 }
 0x864   :  { %4836 = vmatprep.mubr.f32.mxu1 %v6020_v47 }
 0x867   :  { %4837 = vmatmul.mubr.f32.gmra.mrb[94].mxu1 %v6027_v48 }
 0x868   :  { %4903 = vmatprep.mubr.f32.mxu1 %v5925_v9 }
 0x91e   :  { %v4817_v30 = vpop.f32.mrb[80].mxu1 }
 0x91f   :  { %v2420_v31 = vadd.f32 %v4817_v30, %v3842_v29  ;;  %v2414_v32 = vpop.f32.mrb[81].mxu1 }
 0x920   :  { %v2415_v7 = vadd.f32 %v3842_v29, %v2414_v32 }
 0x921   :  { %v2494_v3 = vmax.f32 %v2420_v31, 0.0 }
 0x922   :  { %v2493_v33 = vmax.f32 %v2415_v7, 0.0  ;;  %v4820_v34 = vpop.f32.mrb[82].mxu1 }
 0x923   :  { %v2430_v35 = vadd.f32 %v4820_v34, %v3842_v29  ;;  %v2424_v36 = vpop.f32.mrb[83].mxu1 }
 0x924   :  { %v2425_v37 = vadd.f32 %v3842_v29, %v2424_v36  ;;  %4847 = vmatprep.mubr.msk.f32.mxu0 %vm42_vm0, %v2493_v33 }
 0x925   :  { %4848 = vmatmul.mubr.msk.f32.vlgmr.msra.gmra.mrb[96].mxu0 %vm42_vm0, %v2494_v3  ;;  %v2496_v4 = vmax.f32 %v2430_v35, 0.0 }
 0x926   :  { %v2495_v42 = vmax.f32 %v2425_v37, 0.0  ;;  %v4823_v9 = vpop.f32.mrb[84].mxu1  ;;  %5314 = vmatpush3.bf16.msra.mxu0 %v5311_v50 }
 0x927   :  { %v2440_v47 = vadd.f32 %v4823_v9, %v3842_v29  ;;  %v2434_v48 = vpop.f32.mrb[85].mxu1  ;;  %5316 = vmatprep.subr.bf16.mxu0 %v5315_v22 }
 0x928   :  { %v2435_v27 = vadd.f32 %v3842_v29, %v2434_v48  ;;  %4850 = vmatprep.mubr.msk.f32.mxu0 %vm42_vm0, %v2495_v42  ;;  %v6206_v48 = vld [vmem:[%s6446_s1 + $0x8] sm:$0xff] }
 0x929   :  { %4851 = vmatmul.mubr.msk.f32.gmra.mrb[98].mxu0 %vm42_vm0, %v2496_v4  ;;  %v2498_v46 = vmax.f32 %v2440_v47, 0.0 }
 0x92a   :  { %v2497_v28 = vmax.f32 %v2435_v27, 0.0  ;;  %v4826_v0 = vpop.f32.mrb[86].mxu1  ;;  %5318 = vmatpush3.bf16.msra.mxu0 %v5315_v22  ;;  %v6212_v27 = vld [vmem:[%s6446_s1 + $0x10] sm:$0xff] }
 0x92b   :  { %v2450_v49 = vadd.f32 %v4826_v0, %v3842_v29  ;;  %v2444_v51 = vpop.f32.mrb[87].mxu1  ;;  %v6224_v0 = vld [vmem:[%s6446_s1 + $0x20] sm:$0xff] }
 0x92c   :  { %v2445_v21 = vadd.f32 %v3842_v29, %v2444_v51  ;;  %4853 = vmatprep.mubr.msk.f32.mxu0 %vm42_vm0, %v2497_v28  ;;  %v6218_v28 = vld [vmem:[%s6446_s1 + $0x18] sm:$0xff] }
 0x92d   :  { %4854 = vmatmul.mubr.msk.f32.gmra.mrb[100].mxu0 %vm42_vm0, %v2498_v46  ;;  %v2500_v54 = vmax.f32 %v2450_v49, 0.0  ;;  %v6230_v46 = vld [vmem:[%s6446_s1 + $0x28] sm:$0xff]  ;;  %v6236_v49 = vld [vmem:[%s6446_s1 + $0x30] sm:$0xff]  ;;  %v6242_v51 = vld [vmem:[%s6446_s1 + $0x38] sm:$0xff] }
 0x92e   :  { %v2499_v52 = vmax.f32 %v2445_v21, 0.0  ;;  %v4829_v53 = vpop.f32.mrb[88].mxu1  ;;  %v6248_v21 = vld [vmem:[%s6446_s1 + $0x40] sm:$0xff] }
 0x92f   :  { %v2460_v6 = vadd.f32 %v4829_v53, %v3842_v29  ;;  %v2454_v39 = vpop.f32.mrb[89].mxu1  ;;  %v6260_v53 = vld [vmem:[%s6446_s1 + $0x50] sm:$0xff] }
 0x930   :  { %v2455_v41 = vadd.f32 %v3842_v29, %v2454_v39  ;;  %4856 = vmatprep.mubr.msk.f32.mxu0 %vm42_vm0, %v2499_v52  ;;  %v6254_v52 = vld [vmem:[%s6446_s1 + $0x48] sm:$0xff] }
 0x931   :  { %4857 = vmatmul.mubr.msk.f32.gmra.mrb[102].mxu0 %vm42_vm0, %v2500_v54  ;;  %v2502_v5 = vmax.f32 %v2460_v6, 0.0  ;;  %v6266_v54 = vld [vmem:[%s6446_s1 + $0x58] sm:$0xff]  ;;  %v6272_v6 = vld [vmem:[%s6446_s1 + $0x60] sm:$0xff]  ;;  %v6278_v39 = vld [vmem:[%s6446_s1 + $0x68] sm:$0xff] }
 0x932   :  { %v2501_v56 = vmax.f32 %v2455_v41, 0.0  ;;  %v4832_v62 = vpop.f32.mrb[90].mxu1  ;;  %v6284_v41 = vld [vmem:[%s6446_s1 + $0x70] sm:$0xff] }
 0x933   :  { %v2470_v8 = vadd.f32 %v4832_v62, %v3842_v29  ;;  %v2464_v38 = vpop.f32.mrb[91].mxu1  ;;  %v5403_v62 = vld [vmem:[%s6446_s1] sm:$0xff] }
 0x934   :  { %v2465_v40 = vadd.f32 %v3842_v29, %v2464_v38  ;;  %4859 = vmatprep.mubr.msk.f32.mxu0 %vm42_vm0, %v2501_v56  ;;  %v6290_v56 = vld [vmem:[%s6446_s1 + $0x78] sm:$0xff] }
 0x935   :  { %4860 = vmatmul.mubr.msk.f32.gmra.mrb[104].mxu0 %vm42_vm0, %v2502_v5  ;;  %v2504_v11 = vmax.f32 %v2470_v8, 0.0  ;;  %v3863_v5 = vld [vmem:[%s6445_s3 + $0x8] ss:$0 sm:$0xff] }
 0x936   :  { %v2503_v2 = vmax.f32 %v2465_v40, 0.0  ;;  %v4835_v57 = vpop.f32.mrb[92].mxu1 }
 0x937   :  { %v2480_v58 = vadd.f32 %v4835_v57, %v3842_v29  ;;  %v2474_v12 = vpop.f32.mrb[93].mxu1 }
 0x938   :  { %v2475_v13 = vadd.f32 %v3842_v29, %v2474_v12  ;;  %4862 = vmatprep.mubr.msk.f32.mxu0 %vm42_vm0, %v2503_v2 }
 0x939   :  { %4863 = vmatmul.mubr.msk.f32.gmra.mrb[106].mxu0 %vm42_vm0, %v2504_v11  ;;  %v2506_v14 = vmax.f32 %v2480_v58, 0.0 }
 0x93a   :  { %v2505_v43 = vmax.f32 %v2475_v13, 0.0  ;;  %v4838_v10 = vpop.f32.mrb[94].mxu1 }
 0x93b   :  { %v2490_v15 = vadd.f32 %v4838_v10, %v3842_v29  ;;  %v2484_v16 = vpop.f32.mrb[95].mxu1 }
 0x93c   :  { %v2485_v45 = vadd.f32 %v3842_v29, %v2484_v16  ;;  %4865 = vmatprep.mubr.msk.f32.mxu0 %vm42_vm0, %v2505_v43 }
 0x93d   :  { %4866 = vmatmul.mubr.msk.f32.gmra.mrb[108].mxu0 %vm42_vm0, %v2506_v14  ;;  %v2508_v59 = vmax.f32 %v2490_v15, 0.0 }
 0x93e   :  { %v2507_v17 = vmax.f32 %v2485_v45, 0.0 }
 0x940   :  { %4868 = vmatprep.mubr.msk.f32.mxu0 %vm42_vm0, %v2507_v17 }
 0x941   :  { %4869 = vmatmul.mubr.msk.f32.gmra.mrb[110].mxu0 %vm42_vm0, %v2508_v59 }
 0x9f8   :  { %v4849_v44 = vpop.f32.mrb[96].mxu0 }
 0x9f9   :  { %v2628_v24 = vpop.f32.mrb[97].mxu0 }
 0x9fa   :  { %v5279_v55 = vpack.c.bf16 %v4849_v44, %v2628_v24 }
 0x9fc   :  { %v4852_v60 = vpop.f32.mrb[98].mxu0  ;;  %5280 = vmatprep.subr.bf16.mxu1 %v5279_v55 }
 0x9fd   :  { %v2638_v25 = vpop.f32.mrb[99].mxu0  ;;  %5282 = vmatpush3.bf16.msra.mxu1 %v5279_v55 }
 0x9fe   :  { %v5283_v23 = vpack.c.bf16 %v4852_v60, %v2638_v25 }
 0xa00   :  { %v4855_v63 = vpop.f32.mrb[100].mxu0  ;;  %5284 = vmatprep.subr.bf16.mxu1 %v5283_v23 }
 0xa01   :  { %v2648_v26 = vpop.f32.mrb[101].mxu0  ;;  %5286 = vmatpush3.bf16.msra.mxu1 %v5283_v23 }
 0xa02   :  { %v5287_v1 = vpack.c.bf16 %v4855_v63, %v2648_v26 }
 0xa04   :  { %v4858_v29 = vpop.f32.mrb[102].mxu0  ;;  %5288 = vmatprep.subr.bf16.mxu1 %v5287_v1 }
 0xa05   :  { %v2658_v30 = vpop.f32.mrb[103].mxu0  ;;  %5290 = vmatpush3.bf16.msra.mxu1 %v5287_v1 }
 0xa06   :  { %v5291_v31 = vpack.c.bf16 %v4858_v29, %v2658_v30 }
 0xa08   :  { %v4861_v32 = vpop.f32.mrb[104].mxu0  ;;  %5292 = vmatprep.subr.bf16.mxu1 %v5291_v31 }
 0xa09   :  { %v2668_v7 = vpop.f32.mrb[105].mxu0  ;;  %5294 = vmatpush3.bf16.msra.mxu1 %v5291_v31 }
 0xa0a   :  { %v5295_v33 = vpack.c.bf16 %v4861_v32, %v2668_v7 }
 0xa0c   :  { %v4864_v34 = vpop.f32.mrb[106].mxu0  ;;  %5296 = vmatprep.subr.bf16.mxu1 %v5295_v33 }
 0xa0d   :  { %v2678_v3 = vpop.f32.mrb[107].mxu0  ;;  %5298 = vmatpush3.bf16.msra.mxu1 %v5295_v33 }
 0xa0e   :  { %v5299_v35 = vpack.c.bf16 %v4864_v34, %v2678_v3 }
 0xa10   :  { %v4867_v36 = vpop.f32.mrb[108].mxu0  ;;  %5300 = vmatprep.subr.bf16.mxu1 %v5299_v35 }
 0xa11   :  { %v2688_v37 = vpop.f32.mrb[109].mxu0  ;;  %5302 = vmatpush3.bf16.msra.mxu1 %v5299_v35 }
 0xa12   :  { %v5303_v42 = vpack.c.bf16 %v4867_v36, %v2688_v37 }
 0xa14   :  { %v4870_v9 = vpop.f32.mrb[110].mxu0  ;;  %5304 = vmatprep.subr.bf16.mxu1 %v5303_v42 }
 0xa15   :  { %v2698_v4 = vpop.f32.mrb[111].mxu0  ;;  %5306 = vmatpush3.bf16.msra.mxu1 %v5303_v42 }
 0xa16   :  { %v5307_v47 = vpack.c.bf16 %v4870_v9, %v2698_v4 }
 0xa18   :  { %5308 = vmatprep.subr.bf16.mxu1 %v5307_v47 }
 0xa19   :  { %5310 = vmatpush3.bf16.msra.mxu1 %v5307_v47 }
 0xa1c   :  { %4904 = vmatmul.mubr.f32.vlgmr.msra.gmra.mrb[96].mxu1 %v6206_v48 }
 0xa1d   :  { %4906 = vmatprep.mubr.f32.mxu1 %v6212_v27 }
 0xa20   :  { %4907 = vmatmul.mubr.f32.gmra.mrb[98].mxu1 %v6218_v28 }
 0xa21   :  { %4909 = vmatprep.mubr.f32.mxu1 %v6224_v0 }
 0xa24   :  { %4910 = vmatmul.mubr.f32.gmra.mrb[100].mxu1 %v6230_v46 }
 0xa25   :  { %4912 = vmatprep.mubr.f32.mxu1 %v6236_v49 }
 0xa28   :  { %4913 = vmatmul.mubr.f32.gmra.mrb[102].mxu1 %v6242_v51 }
 0xa29   :  { %4915 = vmatprep.mubr.f32.mxu1 %v6248_v21 }
 0xa2c   :  { %4916 = vmatmul.mubr.f32.gmra.mrb[104].mxu1 %v6254_v52 }
 0xa2d   :  { %4918 = vmatprep.mubr.f32.mxu1 %v6260_v53 }
 0xa30   :  { %4919 = vmatmul.mubr.f32.gmra.mrb[106].mxu1 %v6266_v54 }
 0xa31   :  { %4921 = vmatprep.mubr.f32.mxu1 %v6272_v6 }
 0xa34   :  { %4922 = vmatmul.mubr.f32.gmra.mrb[108].mxu1 %v6278_v39 }
 0xa35   :  { %4924 = vmatprep.mubr.f32.mxu1 %v6284_v41 }
 0xa38   :  { %4925 = vmatmul.mubr.f32.gmra.mrb[110].mxu1 %v6290_v56 }
 0xa39   :  { %4991 = vmatprep.mubr.f32.mxu1 %v5403_v62 }
 0xaef   :  { %v4905_v8 = vpop.f32.mrb[96].mxu1 }
 0xaf0   :  { %v2784_v38 = vadd.f32 %v4905_v8, %v3863_v5  ;;  %v2778_v40 = vpop.f32.mrb[97].mxu1  ;;  %v3885_v8 = vld [vmem:[%s6443_s2 + $0x140] sm:$0xff] }
 0xaf1   :  { %v2779_v2 = vadd.f32 %v3863_v5, %v2778_v40 }
 0xaf2   :  { %v2858_v58 = vmax.f32 %v2784_v38, 0.0  ;;  %v3886_v38 = vld [vmem:[%s6443_s2 + $0x148] sm:$0xff] }
 0xaf3   :  { %v2857_v57 = vmax.f32 %v2779_v2, 0.0  ;;  %v4908_v11 = vpop.f32.mrb[98].mxu1  ;;  %v5351_v40 = vpack.c.bf16 %v3886_v38, %v3885_v8  ;;  %v3888_v2 = vld [vmem:[%s6443_s2 + $0x158] sm:$0xff] }
 0xaf4   :  { %v2794_v12 = vadd.f32 %v4908_v11, %v3863_v5  ;;  %v2788_v13 = vpop.f32.mrb[99].mxu1 }
 0xaf5   :  { %v2789_v43 = vadd.f32 %v3863_v5, %v2788_v13  ;;  %4935 = vmatprep.mubr.msk.f32.mxu0 %vm42_vm0, %v2857_v57  ;;  %5352 = vmatprep.subr.bf16.mxu0 %v5351_v40 }
 0xaf6   :  { %4936 = vmatmul.mubr.msk.f32.vlgmr.msra.gmra.mrb[112].mxu0 %vm42_vm0, %v2858_v58  ;;  %v2860_v15 = vmax.f32 %v2794_v12, 0.0 }
 0xaf7   :  { %v2859_v10 = vmax.f32 %v2789_v43, 0.0  ;;  %v4911_v14 = vpop.f32.mrb[100].mxu1  ;;  %5354 = vmatpush3.bf16.msra.mxu0 %v5351_v40 }
 0xaf8   :  { %v2804_v16 = vadd.f32 %v4911_v14, %v3863_v5  ;;  %v2798_v45 = vpop.f32.mrb[101].mxu1 }
 0xaf9   :  { %v2799_v17 = vadd.f32 %v3863_v5, %v2798_v45  ;;  %4938 = vmatprep.mubr.msk.f32.mxu0 %vm42_vm0, %v2859_v10 }
 0xafa   :  { %4939 = vmatmul.mubr.msk.f32.gmra.mrb[114].mxu0 %vm42_vm0, %v2860_v15  ;;  %v2862_v19 = vmax.f32 %v2804_v16, 0.0 }
 0xafb   :  { %v2861_v59 = vmax.f32 %v2799_v17, 0.0  ;;  %v4914_v18 = vpop.f32.mrb[102].mxu1 }
 0xafc   :  { %v2814_v20 = vadd.f32 %v4914_v18, %v3863_v5  ;;  %v2808_v50 = vpop.f32.mrb[103].mxu1 }
 0xafd   :  { %v2809_v61 = vadd.f32 %v3863_v5, %v2808_v50  ;;  %4941 = vmatprep.mubr.msk.f32.mxu0 %vm42_vm0, %v2861_v59 }
 0xafe   :  { %4942 = vmatmul.mubr.msk.f32.gmra.mrb[116].mxu0 %vm42_vm0, %v2862_v19  ;;  %v2864_v24 = vmax.f32 %v2814_v20, 0.0 }
 0xaff   :  { %v2863_v22 = vmax.f32 %v2809_v61, 0.0  ;;  %v4917_v44 = vpop.f32.mrb[104].mxu1 }
 0xb00   :  { %v2824_v55 = vadd.f32 %v4917_v44, %v3863_v5  ;;  %v2818_v60 = vpop.f32.mrb[105].mxu1 }
 0xb01   :  { %v2819_v25 = vadd.f32 %v3863_v5, %v2818_v60  ;;  %4944 = vmatprep.mubr.msk.f32.mxu0 %vm42_vm0, %v2863_v22 }
 0xb02   :  { %4945 = vmatmul.mubr.msk.f32.gmra.mrb[118].mxu0 %vm42_vm0, %v2864_v24  ;;  %v2866_v26 = vmax.f32 %v2824_v55, 0.0 }
 0xb03   :  { %v2865_v23 = vmax.f32 %v2819_v25, 0.0  ;;  %v4920_v63 = vpop.f32.mrb[106].mxu1 }
 0xb04   :  { %v2834_v1 = vadd.f32 %v4920_v63, %v3863_v5  ;;  %v2828_v29 = vpop.f32.mrb[107].mxu1 }
 0xb05   :  { %v2829_v30 = vadd.f32 %v3863_v5, %v2828_v29  ;;  %4947 = vmatprep.mubr.msk.f32.mxu0 %vm42_vm0, %v2865_v23 }
 0xb06   :  { %4948 = vmatmul.mubr.msk.f32.gmra.mrb[120].mxu0 %vm42_vm0, %v2866_v26  ;;  %v2868_v7 = vmax.f32 %v2834_v1, 0.0 }
 0xb07   :  { %v2867_v31 = vmax.f32 %v2829_v30, 0.0  ;;  %v4923_v32 = vpop.f32.mrb[108].mxu1 }
 0xb08   :  { %v2844_v33 = vadd.f32 %v4923_v32, %v3863_v5  ;;  %v2838_v34 = vpop.f32.mrb[109].mxu1 }
 0xb09   :  { %v2839_v3 = vadd.f32 %v3863_v5, %v2838_v34  ;;  %4950 = vmatprep.mubr.msk.f32.mxu0 %vm42_vm0, %v2867_v31 }
 0xb0a   :  { %4951 = vmatmul.mubr.msk.f32.gmra.mrb[122].mxu0 %vm42_vm0, %v2868_v7  ;;  %v2870_v37 = vmax.f32 %v2844_v33, 0.0 }
 0xb0b   :  { %v2869_v35 = vmax.f32 %v2839_v3, 0.0  ;;  %v4926_v36 = vpop.f32.mrb[110].mxu1 }
 0xb0c   :  { %v2854_v42 = vadd.f32 %v4926_v36, %v3863_v5  ;;  %v2848_v9 = vpop.f32.mrb[111].mxu1 }
 0xb0d   :  { %v2849_v4 = vadd.f32 %v3863_v5, %v2848_v9  ;;  %4953 = vmatprep.mubr.msk.f32.mxu0 %vm42_vm0, %v2869_v35  ;;  %v3887_v5 = vld [vmem:[%s6443_s2 + $0x150] sm:$0xff] }
 0xb0e   :  { %4954 = vmatmul.mubr.msk.f32.gmra.mrb[124].mxu0 %vm42_vm0, %v2870_v37  ;;  %v2872_v62 = vmax.f32 %v2854_v42, 0.0  ;;  %v5355_v57 = vpack.c.bf16 %v3888_v2, %v3887_v5 }
 0xb0f   :  { %v2871_v47 = vmax.f32 %v2849_v4, 0.0 }
 0xb10   :  { %5356 = vmatprep.subr.bf16.mxu0 %v5355_v57 }
 0xb11   :  { %4956 = vmatprep.mubr.msk.f32.mxu0 %vm42_vm0, %v2871_v47  ;;  %5358 = vmatpush3.bf16.msra.mxu0 %v5355_v57 }
 0xb12   :  { %4957 = vmatmul.mubr.msk.f32.gmra.mrb[126].mxu0 %vm42_vm0, %v2872_v62 }
 0xbc9   :  { %v4937_v11 = vpop.f32.mrb[112].mxu0 }
 0xbca   :  { %v2992_v58 = vpop.f32.mrb[113].mxu0 }
 0xbcb   :  { %v5319_v12 = vpack.c.bf16 %v4937_v11, %v2992_v58 }
 0xbcd   :  { %v4940_v13 = vpop.f32.mrb[114].mxu0  ;;  %5320 = vmatprep.subr.bf16.mxu1 %v5319_v12 }
 0xbce   :  { %v3002_v43 = vpop.f32.mrb[115].mxu0  ;;  %5322 = vmatpush3.bf16.msra.mxu1 %v5319_v12 }
 0xbcf   :  { %v5323_v10 = vpack.c.bf16 %v4940_v13, %v3002_v43 }
 0xbd1   :  { %v4943_v14 = vpop.f32.mrb[116].mxu0  ;;  %5324 = vmatprep.subr.bf16.mxu1 %v5323_v10 }
 0xbd2   :  { %v3012_v15 = vpop.f32.mrb[117].mxu0  ;;  %5326 = vmatpush3.bf16.msra.mxu1 %v5323_v10 }
 0xbd3   :  { %v5327_v16 = vpack.c.bf16 %v4943_v14, %v3012_v15 }
 0xbd5   :  { %v4946_v45 = vpop.f32.mrb[118].mxu0  ;;  %5328 = vmatprep.subr.bf16.mxu1 %v5327_v16 }
 0xbd6   :  { %v3022_v17 = vpop.f32.mrb[119].mxu0  ;;  %5330 = vmatpush3.bf16.msra.mxu1 %v5327_v16 }
 0xbd7   :  { %v5331_v59 = vpack.c.bf16 %v4946_v45, %v3022_v17 }
 0xbd9   :  { %v4949_v18 = vpop.f32.mrb[120].mxu0  ;;  %5332 = vmatprep.subr.bf16.mxu1 %v5331_v59 }
 0xbda   :  { %v3032_v19 = vpop.f32.mrb[121].mxu0  ;;  %5334 = vmatpush3.bf16.msra.mxu1 %v5331_v59 }
 0xbdb   :  { %v5335_v20 = vpack.c.bf16 %v4949_v18, %v3032_v19 }
 0xbdd   :  { %v4952_v50 = vpop.f32.mrb[122].mxu0  ;;  %5336 = vmatprep.subr.bf16.mxu1 %v5335_v20 }
 0xbde   :  { %v3042_v61 = vpop.f32.mrb[123].mxu0  ;;  %5338 = vmatpush3.bf16.msra.mxu1 %v5335_v20 }
 0xbdf   :  { %v5339_v22 = vpack.c.bf16 %v4952_v50, %v3042_v61  ;;  %v3889_v50 = vld [vmem:[%s6445_s3 + $0xa] ss:$0 sm:$0xff] }
 0xbe1   :  { %v4955_v44 = vpop.f32.mrb[124].mxu0  ;;  %5340 = vmatprep.subr.bf16.mxu1 %v5339_v22 }
 0xbe2   :  { %v3052_v24 = vpop.f32.mrb[125].mxu0  ;;  %5342 = vmatpush3.bf16.msra.mxu1 %v5339_v22 }
 0xbe3   :  { %v5343_v55 = vpack.c.bf16 %v4955_v44, %v3052_v24 }
 0xbe5   :  { %v4958_v60 = vpop.f32.mrb[126].mxu0  ;;  %5344 = vmatprep.subr.bf16.mxu1 %v5343_v55 }
 0xbe6   :  { %v3062_v25 = vpop.f32.mrb[127].mxu0  ;;  %5346 = vmatpush3.bf16.msra.mxu1 %v5343_v55 }
 0xbe7   :  { %v5347_v23 = vpack.c.bf16 %v4958_v60, %v3062_v25 }
 0xbe9   :  { %5348 = vmatprep.subr.bf16.mxu1 %v5347_v23 }
 0xbea   :  { %5350 = vmatpush3.bf16.msra.mxu1 %v5347_v23 }
 0xbed   :  { %4992 = vmatmul.mubr.f32.vlgmr.msra.gmra.mrb[112].mxu1 %v6206_v48  ;;  %v3906_v48 = vld [vmem:[%s6443_s2 + $0x160] sm:$0xff] }
 0xbee   :  { %4994 = vmatprep.mubr.f32.mxu1 %v6212_v27  ;;  %v3907_v27 = vld [vmem:[%s6443_s2 + $0x168] sm:$0xff] }
 0xbf1   :  { %4995 = vmatmul.mubr.f32.gmra.mrb[114].mxu1 %v6218_v28  ;;  %v3908_v28 = vld [vmem:[%s6443_s2 + $0x170] sm:$0xff] }
 0xbf2   :  { %4997 = vmatprep.mubr.f32.mxu1 %v6224_v0  ;;  %v5359_v0 = vpack.c.bf16 %v3907_v27, %v3906_v48 }
 0xbf4   :  { %5360 = vmatprep.subr.bf16.mxu1 %v5359_v0 }
 0xbf5   :  { %4998 = vmatmul.mubr.f32.gmra.mrb[116].mxu1 %v6230_v46  ;;  %v3909_v46 = vld [vmem:[%s6443_s2 + $0x178] sm:$0xff] }
 0xbf6   :  { %5000 = vmatprep.mubr.f32.mxu1 %v6236_v49  ;;  %v5363_v49 = vpack.c.bf16 %v3909_v46, %v3908_v28  ;;  %5362 = vmatpush3.bf16.msra.mxu1 %v5359_v0 }
 0xbf8   :  { %5364 = vmatprep.subr.bf16.mxu1 %v5363_v49 }
 0xbf9   :  { %5001 = vmatmul.mubr.f32.gmra.mrb[118].mxu1 %v6242_v51  ;;  %v3884_v51 = vld [vmem:[%s6445_s3 + $0x9] ss:$0 sm:$0xff] }
 0xbfa   :  { %5003 = vmatprep.mubr.f32.mxu1 %v6248_v21  ;;  %5366 = vmatpush3.bf16.msra.mxu1 %v5363_v49 }
 0xbfd   :  { %5004 = vmatmul.mubr.f32.gmra.mrb[120].mxu1 %v6254_v52 }
 0xbfe   :  { %5006 = vmatprep.mubr.f32.mxu1 %v6260_v53 }
 0xc01   :  { %5007 = vmatmul.mubr.f32.gmra.mrb[122].mxu1 %v6266_v54 }
 0xc02   :  { %5009 = vmatprep.mubr.f32.mxu1 %v6272_v6 }
 0xc05   :  { %5010 = vmatmul.mubr.f32.gmra.mrb[124].mxu1 %v6278_v39 }
 0xc06   :  { %5012 = vmatprep.mubr.f32.mxu1 %v6284_v41 }
 0xc09   :  { %5013 = vmatmul.mubr.f32.gmra.mrb[126].mxu1 %v6290_v56 }
 0xcc0   :  { %v4993_v21 = vpop.f32.mrb[112].mxu1 }
 0xcc1   :  { %v3148_v52 = vadd.f32 %v4993_v21, %v3884_v51  ;;  %v3142_v53 = vpop.f32.mrb[113].mxu1 }
 0xcc2   :  { %v3143_v54 = vadd.f32 %v3884_v51, %v3142_v53 }
 0xcc3   :  { %v3222_v41 = vmax.f32 %v3148_v52, 0.0 }
 0xcc4   :  { %v3221_v6 = vmax.f32 %v3143_v54, 0.0  ;;  %v4996_v39 = vpop.f32.mrb[114].mxu1 }
 0xcc5   :  { %v3158_v56 = vadd.f32 %v4996_v39, %v3884_v51  ;;  %v3152_v63 = vpop.f32.mrb[115].mxu1 }
 0xcc6   :  { %v3153_v26 = vadd.f32 %v3884_v51, %v3152_v63  ;;  %5023 = vmatprep.mubr.msk.f32.mxu0 %vm42_vm0, %v3221_v6 }
 0xcc7   :  { %5024 = vmatmul.mubr.msk.f32.vlgmr.msra.gmra.mrb[128].mxu0 %vm42_vm0, %v3222_v41  ;;  %v3224_v30 = vmax.f32 %v3158_v56, 0.0 }
 0xcc8   :  { %v3223_v1 = vmax.f32 %v3153_v26, 0.0  ;;  %v4999_v29 = vpop.f32.mrb[116].mxu1 }
 0xcc9   :  { %v3168_v31 = vadd.f32 %v4999_v29, %v3884_v51  ;;  %v3162_v32 = vpop.f32.mrb[117].mxu1 }
 0xcca   :  { %v3163_v7 = vadd.f32 %v3884_v51, %v3162_v32  ;;  %5026 = vmatprep.mubr.msk.f32.mxu0 %vm42_vm0, %v3223_v1 }
 0xccb   :  { %5027 = vmatmul.mubr.msk.f32.gmra.mrb[130].mxu0 %vm42_vm0, %v3224_v30  ;;  %v3226_v3 = vmax.f32 %v3168_v31, 0.0 }
 0xccc   :  { %v3225_v33 = vmax.f32 %v3163_v7, 0.0  ;;  %v5002_v34 = vpop.f32.mrb[118].mxu1 }
 0xccd   :  { %v3178_v35 = vadd.f32 %v5002_v34, %v3884_v51  ;;  %v3172_v36 = vpop.f32.mrb[119].mxu1 }
 0xcce   :  { %v3173_v37 = vadd.f32 %v3884_v51, %v3172_v36  ;;  %5029 = vmatprep.mubr.msk.f32.mxu0 %vm42_vm0, %v3225_v33 }
 0xccf   :  { %5030 = vmatmul.mubr.msk.f32.gmra.mrb[132].mxu0 %vm42_vm0, %v3226_v3  ;;  %v3228_v4 = vmax.f32 %v3178_v35, 0.0 }
 0xcd0   :  { %v3227_v42 = vmax.f32 %v3173_v37, 0.0  ;;  %v5005_v9 = vpop.f32.mrb[120].mxu1 }
 0xcd1   :  { %v3188_v47 = vadd.f32 %v5005_v9, %v3884_v51  ;;  %v3182_v62 = vpop.f32.mrb[121].mxu1 }
 0xcd2   :  { %v3183_v8 = vadd.f32 %v3884_v51, %v3182_v62  ;;  %5032 = vmatprep.mubr.msk.f32.mxu0 %vm42_vm0, %v3227_v42 }
 0xcd3   :  { %5033 = vmatmul.mubr.msk.f32.gmra.mrb[134].mxu0 %vm42_vm0, %v3228_v4  ;;  %v3230_v40 = vmax.f32 %v3188_v47, 0.0 }
 0xcd4   :  { %v3229_v38 = vmax.f32 %v3183_v8, 0.0  ;;  %v5008_v5 = vpop.f32.mrb[122].mxu1 }
 0xcd5   :  { %v3198_v2 = vadd.f32 %v5008_v5, %v3884_v51  ;;  %v3192_v57 = vpop.f32.mrb[123].mxu1 }
 0xcd6   :  { %v3193_v11 = vadd.f32 %v3884_v51, %v3192_v57  ;;  %5035 = vmatprep.mubr.msk.f32.mxu0 %vm42_vm0, %v3229_v38 }
 0xcd7   :  { %5036 = vmatmul.mubr.msk.f32.gmra.mrb[136].mxu0 %vm42_vm0, %v3230_v40  ;;  %v3232_v13 = vmax.f32 %v3198_v2, 0.0 }
 0xcd8   :  { %v3231_v58 = vmax.f32 %v3193_v11, 0.0  ;;  %v5011_v12 = vpop.f32.mrb[124].mxu1  ;;  %v3910_v11 = vld [vmem:[%s6445_s3 + $0xb] ss:$0 sm:$0xff] }
 0xcd9   :  { %v3208_v43 = vadd.f32 %v5011_v12, %v3884_v51  ;;  %v3202_v10 = vpop.f32.mrb[125].mxu1 }
 0xcda   :  { %v3203_v14 = vadd.f32 %v3884_v51, %v3202_v10  ;;  %5038 = vmatprep.mubr.msk.f32.mxu0 %vm42_vm0, %v3231_v58 }
 0xcdb   :  { %5039 = vmatmul.mubr.msk.f32.gmra.mrb[138].mxu0 %vm42_vm0, %v3232_v13  ;;  %v3234_v45 = vmax.f32 %v3208_v43, 0.0 }
 0xcdc   :  { %v3233_v15 = vmax.f32 %v3203_v14, 0.0  ;;  %v5014_v16 = vpop.f32.mrb[126].mxu1 }
 0xcdd   :  { %v3218_v17 = vadd.f32 %v5014_v16, %v3884_v51  ;;  %v3212_v59 = vpop.f32.mrb[127].mxu1 }
 0xcde   :  { %v3213_v18 = vadd.f32 %v3884_v51, %v3212_v59  ;;  %5041 = vmatprep.mubr.msk.f32.mxu0 %vm42_vm0, %v3233_v15 }
 0xcdf   :  { %5042 = vmatmul.mubr.msk.f32.gmra.mrb[140].mxu0 %vm42_vm0, %v3234_v45  ;;  %v3236_v20 = vmax.f32 %v3218_v17, 0.0 }
 0xce0   :  { %v3235_v19 = vmax.f32 %v3213_v18, 0.0 }
 0xce2   :  { %5044 = vmatprep.mubr.msk.f32.mxu0 %vm42_vm0, %v3235_v19 }
 0xce3   :  { %5045 = vmatmul.mubr.msk.f32.gmra.mrb[142].mxu0 %vm42_vm0, %v3236_v20 }
 0xd9a   :  { %v5025_v61 = vpop.f32.mrb[128].mxu0 }
 0xd9b   :  { %v3367_v22 = vadd.f32 %v5025_v61, %v3889_v50  ;;  %v3361_v44 = vpop.f32.mrb[129].mxu0 }
 0xd9c   :  { %v3362_v24 = vadd.f32 %v3889_v50, %v3361_v44 }
 0xd9d   :  { %v3441_v25 = vmax.f32 %v3367_v22, 0.0 }
 0xd9e   :  { %v3440_v55 = vmax.f32 %v3362_v24, 0.0  ;;  %v5028_v60 = vpop.f32.mrb[130].mxu0 }
 0xd9f   :  { %v3377_v23 = vadd.f32 %v5028_v60, %v3889_v50  ;;  %v3371_v48 = vpop.f32.mrb[131].mxu0 }
 0xda0   :  { %v3372_v27 = vadd.f32 %v3889_v50, %v3371_v48  ;;  %5055 = vmatprep.mubr.msk.f32.mxu1 %vm42_vm0, %v3440_v55 }
 0xda1   :  { %5056 = vmatmul.mubr.msk.f32.vlgmr.msra.gmra.mrb[128].mxu1 %vm42_vm0, %v3441_v25  ;;  %v3443_v46 = vmax.f32 %v3377_v23, 0.0 }
 0xda2   :  { %v3442_v28 = vmax.f32 %v3372_v27, 0.0  ;;  %v5031_v0 = vpop.f32.mrb[132].mxu0 }
 0xda3   :  { %v3387_v49 = vadd.f32 %v5031_v0, %v3889_v50  ;;  %v3381_v51 = vpop.f32.mrb[133].mxu0 }
 0xda4   :  { %v3382_v21 = vadd.f32 %v3889_v50, %v3381_v51  ;;  %5058 = vmatprep.mubr.msk.f32.mxu1 %vm42_vm0, %v3442_v28 }
 0xda5   :  { %5059 = vmatmul.mubr.msk.f32.gmra.mrb[130].mxu1 %vm42_vm0, %v3443_v46  ;;  %v3445_v54 = vmax.f32 %v3387_v49, 0.0 }
 0xda6   :  { %v3444_v52 = vmax.f32 %v3382_v21, 0.0  ;;  %v5034_v53 = vpop.f32.mrb[134].mxu0 }
 0xda7   :  { %v3397_v6 = vadd.f32 %v5034_v53, %v3889_v50  ;;  %v3391_v39 = vpop.f32.mrb[135].mxu0 }
 0xda8   :  { %v3392_v41 = vadd.f32 %v3889_v50, %v3391_v39  ;;  %5061 = vmatprep.mubr.msk.f32.mxu1 %vm42_vm0, %v3444_v52 }
 0xda9   :  { %5062 = vmatmul.mubr.msk.f32.gmra.mrb[132].mxu1 %vm42_vm0, %v3445_v54  ;;  %v3447_v26 = vmax.f32 %v3397_v6, 0.0 }
 0xdaa   :  { %v3446_v56 = vmax.f32 %v3392_v41, 0.0  ;;  %v5037_v63 = vpop.f32.mrb[136].mxu0 }
 0xdab   :  { %v3407_v1 = vadd.f32 %v5037_v63, %v3889_v50  ;;  %v3401_v29 = vpop.f32.mrb[137].mxu0 }
 0xdac   :  { %v3402_v30 = vadd.f32 %v3889_v50, %v3401_v29  ;;  %5064 = vmatprep.mubr.msk.f32.mxu1 %vm42_vm0, %v3446_v56 }
 0xdad   :  { %5065 = vmatmul.mubr.msk.f32.gmra.mrb[134].mxu1 %vm42_vm0, %v3447_v26  ;;  %v3449_v7 = vmax.f32 %v3407_v1, 0.0 }
 0xdae   :  { %v3448_v31 = vmax.f32 %v3402_v30, 0.0  ;;  %v5040_v32 = vpop.f32.mrb[138].mxu0 }
 0xdaf   :  { %v3417_v33 = vadd.f32 %v5040_v32, %v3889_v50  ;;  %v3411_v34 = vpop.f32.mrb[139].mxu0 }
 0xdb0   :  { %v3412_v3 = vadd.f32 %v3889_v50, %v3411_v34  ;;  %5067 = vmatprep.mubr.msk.f32.mxu1 %vm42_vm0, %v3448_v31 }
 0xdb1   :  { %5068 = vmatmul.mubr.msk.f32.gmra.mrb[136].mxu1 %vm42_vm0, %v3449_v7  ;;  %v3451_v37 = vmax.f32 %v3417_v33, 0.0 }
 0xdb2   :  { %v3450_v35 = vmax.f32 %v3412_v3, 0.0  ;;  %v5043_v36 = vpop.f32.mrb[140].mxu0 }
 0xdb3   :  { %v3427_v42 = vadd.f32 %v5043_v36, %v3889_v50  ;;  %v3421_v9 = vpop.f32.mrb[141].mxu0 }
 0xdb4   :  { %v3422_v4 = vadd.f32 %v3889_v50, %v3421_v9  ;;  %5070 = vmatprep.mubr.msk.f32.mxu1 %vm42_vm0, %v3450_v35 }
 0xdb5   :  { %5071 = vmatmul.mubr.msk.f32.gmra.mrb[138].mxu1 %vm42_vm0, %v3451_v37  ;;  %v3453_v8 = vmax.f32 %v3427_v42, 0.0 }
 0xdb6   :  { %v3452_v47 = vmax.f32 %v3422_v4, 0.0  ;;  %v5046_v62 = vpop.f32.mrb[142].mxu0 }
 0xdb7   :  { %v3437_v38 = vadd.f32 %v5046_v62, %v3889_v50  ;;  %v3431_v5 = vpop.f32.mrb[143].mxu0 }
 0xdb8   :  { %v3432_v40 = vadd.f32 %v3889_v50, %v3431_v5  ;;  %5073 = vmatprep.mubr.msk.f32.mxu1 %vm42_vm0, %v3452_v47 }
 0xdb9   :  { %5074 = vmatmul.mubr.msk.f32.gmra.mrb[140].mxu1 %vm42_vm0, %v3453_v8  ;;  %v3455_v57 = vmax.f32 %v3437_v38, 0.0 }
 0xdba   :  { %v3454_v2 = vmax.f32 %v3432_v40, 0.0 }
 0xdbc   :  { %5076 = vmatprep.mubr.msk.f32.mxu1 %vm42_vm0, %v3454_v2 }
 0xdbd   :  { %5077 = vmatmul.mubr.msk.f32.gmra.mrb[142].mxu1 %vm42_vm0, %v3455_v57 }
 0xe74   :  { %v5057_v58 = vpop.f32.mrb[128].mxu1 }
 0xe75   :  { %v3586_v12 = vadd.f32 %v5057_v58, %v3910_v11  ;;  %v3580_v13 = vpop.f32.mrb[129].mxu1 }
 0xe76   :  { %v3581_v43 = vadd.f32 %v3910_v11, %v3580_v13 }
 0xe77   :  { %3660 = vst [vmem:[%s6447_s4 + $0x8] sm:$0xff] %v3586_v12 }
 0xe78   :  { %3659 = vst [vmem:[%s6447_s4] sm:$0xff] %v3581_v43  ;;  %v5060_v10 = vpop.f32.mrb[130].mxu1 }
 0xe79   :  { %v3596_v14 = vadd.f32 %v5060_v10, %v3910_v11  ;;  %v3590_v15 = vpop.f32.mrb[131].mxu1 }
 0xe7a   :  { %v3591_v16 = vadd.f32 %v3910_v11, %v3590_v15 }
 0xe7b   :  { %3662 = vst [vmem:[%s6447_s4 + $0x18] sm:$0xff] %v3596_v14 }
 0xe7c   :  { %3661 = vst [vmem:[%s6447_s4 + $0x10] sm:$0xff] %v3591_v16  ;;  %v5063_v45 = vpop.f32.mrb[132].mxu1 }
 0xe7d   :  { %v3606_v17 = vadd.f32 %v5063_v45, %v3910_v11  ;;  %v3600_v59 = vpop.f32.mrb[133].mxu1 }
 0xe7e   :  { %v3601_v18 = vadd.f32 %v3910_v11, %v3600_v59 }
 0xe7f   :  { %3664 = vst [vmem:[%s6447_s4 + $0x28] sm:$0xff] %v3606_v17 }
 0xe80   :  { %3663 = vst [vmem:[%s6447_s4 + $0x20] sm:$0xff] %v3601_v18  ;;  %v5066_v19 = vpop.f32.mrb[134].mxu1 }
 0xe81   :  { %v3616_v20 = vadd.f32 %v5066_v19, %v3910_v11  ;;  %v3610_v50 = vpop.f32.mrb[135].mxu1 }
 0xe82   :  { %v3611_v61 = vadd.f32 %v3910_v11, %v3610_v50 }
 0xe83   :  { %3666 = vst [vmem:[%s6447_s4 + $0x38] sm:$0xff] %v3616_v20 }
 0xe84   :  { %3665 = vst [vmem:[%s6447_s4 + $0x30] sm:$0xff] %v3611_v61  ;;  %v5069_v22 = vpop.f32.mrb[136].mxu1 }
 0xe85   :  { %v3626_v44 = vadd.f32 %v5069_v22, %v3910_v11  ;;  %v3620_v24 = vpop.f32.mrb[137].mxu1 }
 0xe86   :  { %v3621_v55 = vadd.f32 %v3910_v11, %v3620_v24 }
 0xe87   :  { %3668 = vst [vmem:[%s6447_s4 + $0x48] sm:$0xff] %v3626_v44 }
 0xe88   :  { %3667 = vst [vmem:[%s6447_s4 + $0x40] sm:$0xff] %v3621_v55  ;;  %v5072_v60 = vpop.f32.mrb[138].mxu1 }
 0xe89   :  { %v3636_v25 = vadd.f32 %v5072_v60, %v3910_v11  ;;  %v3630_v23 = vpop.f32.mrb[139].mxu1 }
 0xe8a   :  { %v3631_v48 = vadd.f32 %v3910_v11, %v3630_v23 }
 0xe8b   :  { %3670 = vst [vmem:[%s6447_s4 + $0x58] sm:$0xff] %v3636_v25 }
 0xe8c   :  { %3669 = vst [vmem:[%s6447_s4 + $0x50] sm:$0xff] %v3631_v48  ;;  %v5075_v27 = vpop.f32.mrb[140].mxu1 }
 0xe8d   :  { %v3646_v28 = vadd.f32 %v5075_v27, %v3910_v11  ;;  %v3640_v0 = vpop.f32.mrb[141].mxu1 }
 0xe8e   :  { %v3641_v46 = vadd.f32 %v3910_v11, %v3640_v0 }
 0xe8f   :  { %3672 = vst [vmem:[%s6447_s4 + $0x68] sm:$0xff] %v3646_v28 }
 0xe90   :  { %3671 = vst [vmem:[%s6447_s4 + $0x60] sm:$0xff] %v3641_v46  ;;  %v5078_v49 = vpop.f32.mrb[142].mxu1 }
 0xe91   :  { %v3656_v51 = vadd.f32 %v5078_v49, %v3910_v11  ;;  %v3650_v21 = vpop.f32.mrb[143].mxu1 }
 0xe92   :  { %v3651_v52 = vadd.f32 %v3910_v11, %v3650_v21 }
 0xe93   :  { %3674 = vst [vmem:[%s6447_s4 + $0x78] sm:$0xff] %v3656_v51 }
 0xe94   :  { %3673 = vst [vmem:[%s6447_s4 + $0x70] sm:$0xff] %v3651_v52 }

</bundles_post_ra>
